<compile_context>
chip_gen: v7x
topology: tpu7x:2x2x1
jax: 0.10.0
libtpu: 0.0.40
codegen_flags: <defaults>
</compile_context>

<pallas_src>
import numpy as np

import jax
import jax.numpy as jnp
from jax.experimental import pallas as pl
from jax.experimental.pallas import tpu as pltpu

BN_EPS = 1e-5


def _pixel_branch_kernel(xp_ref, mask_ref, w1_ref, b1_ref, g_ref, be_ref,
                         w2_ref, b2_ref, out_ref):
    B, C2, Tp = out_ref.shape
    Np = xp_ref.shape[1]            # lane-dense padded column count (multiple of 128)
    SEG = Np // (2 * B)             # lanes per (parity, batch) segment
    TH = Tp + 1                     # valid conv1 positions materialized per segment
    half = Np // 2                  # even-block | odd-block boundary
    n_valid = 2 * B * TH            # = B * T1 conv1 positions feeding BN stats
    HI = jax.lax.Precision.HIGHEST

    # ---- Conv1d(1 -> C1, k=K1): ONE MXU matmul over de-interleaved im2col patches.
    h = jnp.dot(w1_ref[...], xp_ref[...], precision=HI,
                preferred_element_type=jnp.float32) + b1_ref[...]       # (C1, Np)

    # ---- BatchNorm1d, training-mode biased batch stats (two-pass, pad cols masked).
    m = mask_ref[...]                                                   # (1, Np)
    inv_n = 1.0 / n_valid
    mean = jnp.sum(h * m, axis=1, keepdims=True) * inv_n                # (C1, 1)
    d = (h - mean) * m
    var = jnp.sum(d * d, axis=1, keepdims=True) * inv_n                 # (C1, 1)
    scale = g_ref[...] * jax.lax.rsqrt(var + BN_EPS)                    # EUP rsqrt
    shift = be_ref[...] - mean * scale
    h = jnp.maximum(h * scale + shift, 0.0)                             # BN + ReLU

    # ---- Conv1d(C1 -> C2, k=3): ONE matmul, contraction K2*C1 = 192.
    # Column c of h holds conv1 position (2*t + par) of batch b, so conv2 tap k at
    # output column c needs h at (2*t + par + k):
    #   tap 0 -> h itself; tap 1 -> [odd-block | even-block shifted by one];
    #   tap 2 -> h shifted by one segment-local step.
    # The +1 shift never crosses a used segment boundary (t+1 <= Tp < TH <= SEG).
    hs1 = jnp.concatenate([h[:, 1:], h[:, :1]], axis=1)        # shift-left-by-1 view
    blk1 = jnp.concatenate([h[:, half:], hs1[:, :half]], axis=1)
    a = jnp.concatenate([h, blk1, hs1], axis=0)                         # (3*C1, Np)
    zraw = jnp.dot(w2_ref[...], a, precision=HI,
                   preferred_element_type=jnp.float32)                  # (C2, Np)

    # ---- MaxPool1d(2) == max(even half, odd half); bias + ReLU commute with max,
    #      so apply them once on the pooled half-width slab.
    pooled = jnp.maximum(
        jnp.maximum(zraw[:, :half], zraw[:, half:]) + b2_ref[...], 0.0)  # (C2, B*SEG)

    # ---- Emit channel-major (B, C2, Tp): one SEG-aligned lane slice + store / batch.
    # TODO(synk): for large B emit the (C2, B*SEG) slab with a single lane-dense
    #             store and do the per-batch slicing/reshape in the wrapper.
    for b in range(B):                                                   # static unroll
        out_ref[b, :, :] = pooled[:, b * SEG: b * SEG + Tp]


def pixel_branch_forward(x, params):
    """x: (B, 1, L) float32 in PyTorch NCW layout. Returns (B, C2 * ((L - 12) // 2))."""
    w1, b1, gamma, beta, w2, b2 = params
    B, Cin, L = x.shape
    C1, _, K1 = w1.shape
    C2, _, K2 = w2.shape
    T1 = L - K1 + 1                 # conv1 output length
    T2 = T1 - K2 + 1                # conv2 output length
    Tp = T2 // 2                    # pooled length
    TH = Tp + 1                     # even/odd conv1 positions materialized per batch
    assert Cin == 1 and K2 == 3 and Tp >= 1, "input too short for this branch"
    assert T1 == 2 * TH, "T1 must be even so BN batch stats cover every position"

    # Lane-dense padded column count; SEG lanes per (parity, batch) segment.
    Np = ((2 * B * TH + 127) // 128) * 128
    assert Np % (2 * B) == 0, "2*B must divide the padded lane count"
    SEG = Np // (2 * B)
    assert SEG >= TH

    x2 = x[:, 0, :].astype(jnp.float32)                                 # (B, L)

    # De-interleaved im2col gather indices (trace-time numpy constants).
    # Column layout: [b0-even, b1-even, ..., b0-odd, ..., b1-odd], SEG lanes each;
    # column (par, b, t) holds the length-K1 x patch starting at position 2*t + par.
    t_idx = np.arange(SEG)
    valid = t_idx < TH
    col_b, col_t, col_v = [], [], []
    for par in (0, 1):
        for b in range(B):
            col_b.append(np.full(SEG, b, np.int32))
            col_t.append(np.where(valid, 2 * t_idx + par, 0).astype(np.int32))
            col_v.append(valid.astype(np.float32))
    col_b = np.concatenate(col_b)
    col_t = np.concatenate(col_t)
    mask2d = jnp.asarray(np.concatenate(col_v))[None, :]                # (1, Np)
    pos = col_t[None, :] + np.arange(K1, dtype=np.int32)[:, None]       # (K1, Np) < L
    # One small XLA gather (jit-fused with the pallas_call); replaces the old
    # stack-of-11-slices im2col and keeps the kernel input at (K1, Np).
    xp = x2[col_b[None, :], pos] * mask2d                               # (K1, Np)

    w1_cm = w1[:, 0, :].astype(jnp.float32)                             # (C1, K1)
    # conv2 weights flattened tap-major: block k (C1 wide) holds w2[:, :, k].
    w2_flat = jnp.transpose(w2, (0, 2, 1)).reshape(C2, K2 * C1).astype(jnp.float32)
    b1c = b1.reshape(C1, 1)
    gc = gamma.reshape(C1, 1)
    bec = beta.reshape(C1, 1)
    b2c = b2.reshape(C2, 1)

    vmem = pl.BlockSpec(memory_space=pltpu.MemorySpace.VMEM)
    pooled = pl.pallas_call(
        _pixel_branch_kernel,
        out_shape=jax.ShapeDtypeStruct((B, C2, Tp), jnp.float32),
        in_specs=[vmem] * 8,
        out_specs=vmem,
    )(xp, mask2d, w1_cm, b1c, gc, bec, w2_flat, b2c)

    # PyTorch's .view(B, -1) on the channel-major (B, C2, Tp) result: free reshape.
    return pooled.reshape(B, C2 * Tp)


def ref_forward(x, params):
    """Pure-JAX reference mirroring the PyTorch forward (for validation)."""
    w1, b1, gamma, beta, w2, b2 = params
    hi = jax.lax.Precision.HIGHEST
    y = jax.lax.conv_general_dilated(x, w1, (1,), 'VALID',
                                     dimension_numbers=('NCH', 'OIH', 'NCH'),
                                     precision=hi)
    y = y + b1[None, :, None]
    mean = jnp.mean(y, axis=(0, 2), keepdims=True)
    var = jnp.mean((y - mean) ** 2, axis=(0, 2), keepdims=True)
    y = gamma[None, :, None] * (y - mean) * jax.lax.rsqrt(var + BN_EPS) \
        + beta[None, :, None]
    y = jnp.maximum(y, 0.0)
    y = jax.lax.conv_general_dilated(y, w2, (1,), 'VALID',
                                     dimension_numbers=('NCH', 'OIH', 'NCH'),
                                     precision=hi)
    y = jnp.maximum(y + b2[None, :, None], 0.0)
    B, C, T = y.shape
    Tp = T // 2
    y = y[:, :, :2 * Tp].reshape(B, C, Tp, 2).max(axis=3)
    return y.reshape(B, -1)


def init_params(key):
    # Deterministic synthetic parameters matching the nn.Module shapes.
    C1, C2, K1, K2 = 64, 32, 11, 3
    k1, k2, k3, k4, k5, k6 = jax.random.split(key, 6)
    w1 = jax.random.normal(k1, (C1, 1, K1), jnp.float32) * (1.0 / jnp.sqrt(1 * K1))
    b1 = jax.random.normal(k2, (C1,), jnp.float32) * 0.05
    gamma = 1.0 + 0.1 * jax.random.normal(k3, (C1,), jnp.float32)
    beta = 0.1 * jax.random.normal(k4, (C1,), jnp.float32)
    w2 = jax.random.normal(k5, (C2, C1, K2), jnp.float32) * (1.0 / jnp.sqrt(C1 * K2))
    b2 = jax.random.normal(k6, (C2,), jnp.float32) * 0.05
    return (w1, b1, gamma, beta, w2, b2)


if __name__ == "__main__":
    key = jax.random.PRNGKey(0)
    pkey, xkey = jax.random.split(key)
    params = init_params(pkey)

    B, L = 2, 64                                  # small spectral-pixel input (B, 1, L)
    x = jax.random.normal(xkey, (B, 1, L), jnp.float32)

    out = jax.jit(pixel_branch_forward)(x, params)
    out = jax.block_until_ready(out)

    expected_flat = 32 * ((L - 10 - 2) // 2)      # 32 * 26 = 832
    assert out.shape == (B, expected_flat), out.shape

    ref = ref_forward(x, params)
    err = float(jnp.max(jnp.abs(out - ref)))
    if not bool(jnp.allclose(out, ref, atol=5e-4, rtol=5e-4)):
        raise AssertionError(f"kernel/reference mismatch, max abs err = {err}")

    print("KERNEL_OK")
</pallas_src>

<mosaic_0001>
module attributes {stable_mosaic.version = 11 : i64} {
  func.func @_pixel_branch_kernel(%arg0: memref<11x128xf32, #tpu.memory_space<vmem>>, %arg1: memref<1x128xf32, #tpu.memory_space<vmem>>, %arg2: memref<64x11xf32, #tpu.memory_space<vmem>>, %arg3: memref<64x1xf32, #tpu.memory_space<vmem>>, %arg4: memref<64x1xf32, #tpu.memory_space<vmem>>, %arg5: memref<64x1xf32, #tpu.memory_space<vmem>>, %arg6: memref<32x192xf32, #tpu.memory_space<vmem>>, %arg7: memref<32x1xf32, #tpu.memory_space<vmem>>, %arg8: memref<2x32x26xf32, #tpu.memory_space<vmem>>) attributes {dimension_semantics = [], scalar_prefetch = 0 : i64, scratch_operands = 0 : i64, tpu.core_type = #tpu.core_type<tc>} {
    %c0 = arith.constant 0 : index
    %c0_0 = arith.constant 0 : index
    %0 = vector.load %arg2[%c0, %c0_0] : memref<64x11xf32, #tpu.memory_space<vmem>>, vector<64x11xf32>
    %c0_1 = arith.constant 0 : index
    %c0_2 = arith.constant 0 : index
    %1 = vector.load %arg0[%c0_1, %c0_2] : memref<11x128xf32, #tpu.memory_space<vmem>>, vector<11x128xf32>
    %cst = arith.constant dense<0.000000e+00> : vector<64x128xf32>
    %2 = tpu.matmul %0, %1, %cst {dimension_numbers = #tpu.dot_dimension_numbers<[1], [0], [0], [1], [0, 0, 1, 1], [], []>, precision = #tpu.contract_precision<fp32>} : vector<64x11xf32>, vector<11x128xf32>, vector<64x128xf32> -> vector<64x128xf32>
    %c0_3 = arith.constant 0 : index
    %c0_4 = arith.constant 0 : index
    %3 = vector.load %arg3[%c0_3, %c0_4] : memref<64x1xf32, #tpu.memory_space<vmem>>, vector<64x1xf32>
    %4 = vector.broadcast %3 : vector<64x1xf32> to vector<64x128xf32>
    %5 = arith.addf %2, %4 : vector<64x128xf32>
    %c0_5 = arith.constant 0 : index
    %c0_6 = arith.constant 0 : index
    %6 = vector.load %arg1[%c0_5, %c0_6] : memref<1x128xf32, #tpu.memory_space<vmem>>, vector<1x128xf32>
    %7 = vector.broadcast %6 : vector<1x128xf32> to vector<64x128xf32>
    %8 = arith.mulf %5, %7 : vector<64x128xf32>
    %cst_7 = arith.constant dense<0.000000e+00> : vector<64xf32>
    %9 = vector.multi_reduction <add>, %8, %cst_7 [1] : vector<64x128xf32> to vector<64xf32>
    %10 = vector.shape_cast %9 : vector<64xf32> to vector<64x1xf32>
    %cst_8 = arith.constant 0.00925925932 : f32
    %11 = vector.broadcast %cst_8 : f32 to vector<64x1xf32>
    %12 = arith.mulf %10, %11 : vector<64x1xf32>
    %13 = vector.broadcast %12 : vector<64x1xf32> to vector<64x128xf32>
    %14 = arith.subf %5, %13 : vector<64x128xf32>
    %15 = vector.broadcast %6 : vector<1x128xf32> to vector<64x128xf32>
    %16 = arith.mulf %14, %15 : vector<64x128xf32>
    %17 = arith.mulf %16, %16 : vector<64x128xf32>
    %cst_9 = arith.constant dense<0.000000e+00> : vector<64xf32>
    %18 = vector.multi_reduction <add>, %17, %cst_9 [1] : vector<64x128xf32> to vector<64xf32>
    %19 = vector.shape_cast %18 : vector<64xf32> to vector<64x1xf32>
    %cst_10 = arith.constant 0.00925925932 : f32
    %20 = vector.broadcast %cst_10 : f32 to vector<64x1xf32>
    %21 = arith.mulf %19, %20 : vector<64x1xf32>
    %c0_11 = arith.constant 0 : index
    %c0_12 = arith.constant 0 : index
    %22 = vector.load %arg4[%c0_11, %c0_12] : memref<64x1xf32, #tpu.memory_space<vmem>>, vector<64x1xf32>
    %cst_13 = arith.constant 9.99999974E-6 : f32
    %23 = vector.broadcast %cst_13 : f32 to vector<64x1xf32>
    %24 = arith.addf %21, %23 : vector<64x1xf32>
    %25 = math.rsqrt %24 : vector<64x1xf32>
    %26 = arith.mulf %22, %25 : vector<64x1xf32>
    %c0_14 = arith.constant 0 : index
    %c0_15 = arith.constant 0 : index
    %27 = vector.load %arg5[%c0_14, %c0_15] : memref<64x1xf32, #tpu.memory_space<vmem>>, vector<64x1xf32>
    %28 = arith.mulf %12, %26 : vector<64x1xf32>
    %29 = arith.subf %27, %28 : vector<64x1xf32>
    %30 = vector.broadcast %26 : vector<64x1xf32> to vector<64x128xf32>
    %31 = arith.mulf %5, %30 : vector<64x128xf32>
    %32 = vector.broadcast %29 : vector<64x1xf32> to vector<64x128xf32>
    %33 = arith.addf %31, %32 : vector<64x128xf32>
    %cst_16 = arith.constant 0.000000e+00 : f32
    %34 = vector.broadcast %cst_16 : f32 to vector<64x128xf32>
    %35 = arith.maximumf %33, %34 : vector<64x128xf32>
    %36 = vector.extract_strided_slice %35 {offsets = [0, 1], sizes = [64, 127], strides = [1, 1]} : vector<64x128xf32> to vector<64x127xf32>
    %37 = vector.extract_strided_slice %35 {offsets = [0, 0], sizes = [64, 1], strides = [1, 1]} : vector<64x128xf32> to vector<64x1xf32>
    %38 = tpu.concatenate %36, %37 in 1 : vector<64x127xf32>, vector<64x1xf32> -> vector<64x128xf32>
    %39 = vector.extract_strided_slice %35 {offsets = [0, 64], sizes = [64, 64], strides = [1, 1]} : vector<64x128xf32> to vector<64x64xf32>
    %40 = vector.extract_strided_slice %38 {offsets = [0, 0], sizes = [64, 64], strides = [1, 1]} : vector<64x128xf32> to vector<64x64xf32>
    %41 = tpu.concatenate %39, %40 in 1 : vector<64x64xf32>, vector<64x64xf32> -> vector<64x128xf32>
    %42 = tpu.concatenate %35, %41, %38 in 0 : vector<64x128xf32>, vector<64x128xf32>, vector<64x128xf32> -> vector<192x128xf32>
    %c0_17 = arith.constant 0 : index
    %c0_18 = arith.constant 0 : index
    %43 = vector.load %arg6[%c0_17, %c0_18] : memref<32x192xf32, #tpu.memory_space<vmem>>, vector<32x192xf32>
    %cst_19 = arith.constant dense<0.000000e+00> : vector<32x128xf32>
    %44 = tpu.matmul %43, %42, %cst_19 {dimension_numbers = #tpu.dot_dimension_numbers<[1], [0], [0], [1], [0, 0, 1, 1], [], []>, precision = #tpu.contract_precision<fp32>} : vector<32x192xf32>, vector<192x128xf32>, vector<32x128xf32> -> vector<32x128xf32>
    %45 = vector.extract_strided_slice %44 {offsets = [0, 0], sizes = [32, 64], strides = [1, 1]} : vector<32x128xf32> to vector<32x64xf32>
    %46 = vector.extract_strided_slice %44 {offsets = [0, 64], sizes = [32, 64], strides = [1, 1]} : vector<32x128xf32> to vector<32x64xf32>
    %47 = arith.maximumf %45, %46 : vector<32x64xf32>
    %c0_20 = arith.constant 0 : index
    %c0_21 = arith.constant 0 : index
    %48 = vector.load %arg7[%c0_20, %c0_21] : memref<32x1xf32, #tpu.memory_space<vmem>>, vector<32x1xf32>
    %49 = vector.broadcast %48 : vector<32x1xf32> to vector<32x64xf32>
    %50 = arith.addf %47, %49 : vector<32x64xf32>
    %cst_22 = arith.constant 0.000000e+00 : f32
    %51 = vector.broadcast %cst_22 : f32 to vector<32x64xf32>
    %52 = arith.maximumf %50, %51 : vector<32x64xf32>
    %53 = vector.extract_strided_slice %52 {offsets = [0, 0], sizes = [32, 26], strides = [1, 1]} : vector<32x64xf32> to vector<32x26xf32>
    %c0_23 = arith.constant 0 : index
    %c0_24 = arith.constant 0 : index
    %c0_25 = arith.constant 0 : index
    %54 = vector.load %arg8[%c0_23, %c0_24, %c0_25] : memref<2x32x26xf32, #tpu.memory_space<vmem>>, vector<1x32x26xf32>
    %55 = vector.shape_cast %54 : vector<1x32x26xf32> to vector<32x26xf32>
    %56 = vector.shape_cast %53 : vector<32x26xf32> to vector<1x32x26xf32>
    tpu.vector_store %arg8[%c0_23, %c0_24, %c0_25], %56 {strides = array<i32>} : memref<2x32x26xf32, #tpu.memory_space<vmem>>, vector<1x32x26xf32>,
    %57 = vector.extract_strided_slice %52 {offsets = [0, 32], sizes = [32, 26], strides = [1, 1]} : vector<32x64xf32> to vector<32x26xf32>
    %c1 = arith.constant 1 : index
    %c0_26 = arith.constant 0 : index
    %c0_27 = arith.constant 0 : index
    %58 = vector.load %arg8[%c1, %c0_26, %c0_27] : memref<2x32x26xf32, #tpu.memory_space<vmem>>, vector<1x32x26xf32>
    %59 = vector.shape_cast %58 : vector<1x32x26xf32> to vector<32x26xf32>
    %60 = vector.shape_cast %57 : vector<32x26xf32> to vector<1x32x26xf32>
    tpu.vector_store %arg8[%c1, %c0_26, %c0_27], %60 {strides = array<i32>} : memref<2x32x26xf32, #tpu.memory_space<vmem>>, vector<1x32x26xf32>,
    return
  }
}

</mosaic_0001>

<bundles_post_ra>
// kernel: pixel_branch_forward.1
= control target key start
LH: loop header
LB: loop body
LE: loop exit
PB: predicated region body
PF: predicated region fallthrough
CT: control target
= control target key end

     0   :  { %vm112_vm0 = vcmask 1042432   ;;  %vm87_vm1 = vcmask 89088   ;;  %v2756_v3 = vmov 0   ;;  %s2758_s21 = smov 127   ;;  %vm1211_vm2 = vcmask 523264   ;;  %s3695_s0 = inlined_call_operand.vmem [shape: f32[11,128], index: 0, kind: input, shape index: {}]   ;;  %s3696_s2 = inlined_call_operand.vmem [shape: f32[64,11], index: 2, kind: input, shape index: {}]   ;;  %s3697_s3 = inlined_call_operand.vmem [shape: f32[64,1], index: 3, kind: input, shape index: {}]   ;;  %s3698_s1 = inlined_call_operand.vmem [shape: f32[1,128], index: 1, kind: input, shape index: {}]   ;;  %s3699_s4 = inlined_call_operand.vmem [shape: f32[64,1], index: 4, kind: input, shape index: {}]   ;;  %s3700_s5 = inlined_call_operand.vmem [shape: f32[64,1], index: 5, kind: input, shape index: {}]   ;;  %s3701_s7 = inlined_call_operand.vmem [shape: f32[32,1], index: 7, kind: input, shape index: {}]   ;;  %s3702_s6 = inlined_call_operand.vmem [shape: f32[32,192], index: 6, kind: input, shape index: {}]   ;;  %s3703_s8 = inlined_call_operand.vmem [shape: f32[2,32,26], index: 8, kind: output, shape index: {}]  }
   0x1   :  { %v37_v0 = vld [vmem:[%s3695_s0] sm:$0xff]  ;;  %v38_v1 = vld [vmem:[%s3695_s0 + $0x8] sm:$0x7]  ;;  %2738 = vset.pattern.permute.xlu0 %v2756_v3  ;;  %2739 = vset.pattern.permute.xlu1 %v2756_v3  ;;  %v31_v8 = vld [vmem:[%s3696_s2 + $0x10] sm:$0xff]  ;;  %vm2218_vm3 = vcmask 211968  }
   0x2   :  { %v29_v2 = vld [vmem:[%s3696_s2] sm:$0xff]  ;;  %v114_v4 = vsel %vm112_vm0, %v38_v1, 0  ;;  %v117_v5 = vand.u32 4294901760, %v37_v0  ;;  %v30_v7 = vld [vmem:[%s3696_s2 + $0x8] sm:$0xff]  ;;  %v32_v9 = vld [vmem:[%s3696_s2 + $0x18] sm:$0xff]  ;;  %v95_v13 = vsel %vm87_vm1, %v31_v8, 0 }
   0x3   :  { %v89_v6 = vsel %vm87_vm1, %v29_v2, 0  ;;  %v120_v10 = vand.u32 4294901760, %v114_v4  ;;  %v92_v12 = vsel %vm87_vm1, %v30_v7, 0  ;;  %v33_v14 = vld [vmem:[%s3696_s2 + $0x20] sm:$0xff]  ;;  %v2836_v17 = vand.u32 4294901760, %v95_v13  ;;  %v34_v24 = vld [vmem:[%s3696_s2 + $0x28] sm:$0xff] }
   0x4   :  { %v2825_v11 = vand.u32 4294901760, %v89_v6  ;;  %v2832_v15 = vand.u32 4294901760, %v92_v12  ;;  %v2834_v16 = vsub.f32 %v37_v0, %v117_v5  ;;  %v98_v18 = vsel %vm87_vm1, %v32_v9, 0  ;;  %v39_v19 = vld [vmem:[%s3697_s3] sm:$0xff]  ;;  %v41_v25 = vld [vmem:[%s3697_s3 + $0x10] sm:$0xff]  ;;  %v40_v30 = vld [vmem:[%s3697_s3 + $0x8] sm:$0xff] }
   0x5   :  { %v2842_v20 = vpack.c.bf16 %v120_v10, %v117_v5  ;;  %v2847_v22 = vsub.f32 %v114_v4, %v120_v10  ;;  %v2849_v23 = vand.u32 4294901760, %v98_v18  ;;  %49 = vperm.xlu0 %2738, %v39_v19   ;;  %v2862_v28 = vsub.f32 %v95_v13, %v2836_v17  ;;  %59 = vperm.xlu1 %2739, %v41_v25   ;;  %v42_v35 = vld [vmem:[%s3697_s3 + $0x18] sm:$0xff]  ;;  %v35_v44 = vld [vmem:[%s3696_s2 + $0x30] sm:$0xff]  ;;  %v43_v49 = vld [vmem:[%s3697_s3 + $0x20] sm:$0xff] }
   0x6   :  { %v2845_v21 = vsub.f32 %v89_v6, %v2825_v11  ;;  %v2858_v26 = vsub.f32 %v92_v12, %v2832_v15  ;;  %v266_v27 = vand.u32 4294901760, %v2834_v16  ;;  %v101_v29 = vsel %vm87_vm1, %v33_v14, 0  ;;  %v36_v54 = vld [vmem:[%s3696_s2 + $0x38] sm:$0xff]  ;;  %v44_v55 = vld [vmem:[%s3697_s3 + $0x28] sm:$0xff]  ;;  %v45_v3 = vld [vmem:[%s3697_s3 + $0x30] sm:$0xff] }
   0x7   :  { %2410 = vmatprep.subr.bf16.mxu0 %v2842_v20  ;;  %v273_v32 = vand.u32 4294901760, %v2847_v22  ;;  %v2872_v33 = vsub.f32 %v98_v18, %v2849_v23  ;;  %v2874_v34 = vand.u32 4294901760, %v101_v29  ;;  %v205_v38 = vand.u32 4294901760, %v2862_v28  ;;  %v46_v7 = vld [vmem:[%s3697_s3 + $0x38] sm:$0xff] }
   0x8   :  { %v185_v31 = vand.u32 4294901760, %v2845_v21  ;;  %2412 = vmatpush3.bf16.msra.mxu0 %v2842_v20  ;;  %v195_v36 = vand.u32 4294901760, %v2858_v26  ;;  %v267_v37 = vsub.f32 %v2834_v16, %v266_v27  ;;  %v104_v39 = vsel %vm87_vm1, %v34_v24, 0 }
   0x9   :  { %v274_v41 = vsub.f32 %v2847_v22, %v273_v32  ;;  %v215_v42 = vand.u32 4294901760, %v2872_v33  ;;  %v2894_v43 = vsub.f32 %v101_v29, %v2874_v34  ;;  %54 = vperm.xlu0 %2738, %v40_v30   ;;  %v206_v47 = vsub.f32 %v2862_v28, %v205_v38  ;;  %64 = vperm.xlu1 %2739, %v42_v35  }
   0xa   :  { %v186_v40 = vsub.f32 %v2845_v21, %v185_v31  ;;  %v196_v45 = vsub.f32 %v2858_v26, %v195_v36  ;;  %v268_v46 = vand.u32 4294901760, %v267_v37  ;;  %v2905_v48 = vand.u32 4294901760, %v104_v39 }
   0xb   :  { %v275_v51 = vand.u32 4294901760, %v274_v41  ;;  %v216_v52 = vsub.f32 %v2872_v33, %v215_v42  ;;  %v225_v53 = vand.u32 4294901760, %v2894_v43  ;;  %v207_v57 = vand.u32 4294901760, %v206_v47 }
   0xc   :  { %v187_v50 = vand.u32 4294901760, %v186_v40  ;;  %v197_v56 = vand.u32 4294901760, %v196_v45  ;;  %v2921_v58 = vsub.f32 %v104_v39, %v2905_v48  ;;  %v107_v59 = vsel %vm87_vm1, %v35_v44, 0 }
   0xd   :  { %v2413_v60 = vpack.c.bf16 %v275_v51, %v268_v46  ;;  %v226_v61 = vsub.f32 %v2894_v43, %v225_v53  ;;  %v2927_v62 = vand.u32 4294901760, %v107_v59  ;;  %69 = vperm.xlu0 %2738, %v43_v49   ;;  %v217_v63 = vand.u32 4294901760, %v216_v52  ;;  %74 = vperm.xlu1 %2739, %v44_v55  }
   0xe   :  { %2317 = vmatprep.mubr.f32.mxu0 %v187_v50  ;;  %v235_v0 = vand.u32 4294901760, %v2921_v58  ;;  %v110_v1 = vsel %vm87_vm1, %v36_v54, 0  ;;  %v2417_v2 = vpack.c.bf16 %v2847_v22, %v2834_v16  ;;  %v2425_v25 = vpack.c.bf16 %v273_v32, %v266_v27 }
   0xf   :  { %2318 = vmatmul.mubr.f32.vlgmr.msra.gmra.mrb[0].mxu0 %v197_v56  ;;  %2414 = vmatprep.subr.bf16.mxu0 %v2413_v60  ;;  %v227_v4 = vand.u32 4294901760, %v226_v61  ;;  %v244_v5 = vsub.f32 %v107_v59, %v2927_v62  ;;  %v2937_v6 = vand.u32 4294901760, %v110_v1 }
  0x10   :  { %2320 = vmatprep.mubr.f32.mxu0 %v207_v57  ;;  %2416 = vmatpush3.bf16.msra.mxu0 %v2413_v60  ;;  %v236_v8 = vsub.f32 %v2921_v58, %v235_v0 }
  0x11   :  { %v245_v9 = vand.u32 4294901760, %v244_v5  ;;  %v254_v10 = vsub.f32 %v110_v1, %v2937_v6  ;;  %2418 = vmatprep.subr.bf16.mxu0 %v2417_v2  ;;  %79 = vperm.xlu0 %2738, %v45_v3  }
  0x12   :  { %v237_v12 = vand.u32 4294901760, %v236_v8  ;;  %84 = vperm.xlu1 %2739, %v46_v7  }
  0x13   :  { %2321 = vmatmul.mubr.f32.gmra.mrb[2].mxu0 %v217_v63  ;;  %v246_v13 = vsub.f32 %v244_v5, %v245_v9  ;;  %v255_v14 = vand.u32 4294901760, %v254_v10 }
  0x14   :  { %2323 = vmatprep.mubr.f32.mxu0 %v227_v4 }
  0x15   :  { %v247_v18 = vand.u32 4294901760, %v246_v13  ;;  %v256_v19 = vsub.f32 %v254_v10, %v255_v14 }
  0x17   :  { %2324 = vmatmul.mubr.f32.gmra.mrb[4].mxu0 %v237_v12  ;;  %v257_v24 = vand.u32 4294901760, %v256_v19 }
  0x18   :  { %2326 = vmatprep.mubr.f32.mxu0 %v247_v18 }
  0x1b   :  { %2327 = vmatmul.mubr.f32.gmra.mrb[6].mxu0 %v257_v24 }
  0x1c   :  { %2333 = vmatprep.mubr.f32.mxu0 %v2825_v11 }
  0x1f   :  { %2334 = vmatmul.mubr.f32.vlgmr.msra.gmra.mrb[0].mxu0 %v2832_v15 }
  0x20   :  { %2420 = vmatpush3.bf16.msra.mxu0 %v2417_v2  ;;  %2336 = vmatprep.mubr.f32.mxu0 %v2836_v17 }
  0x21   :  { %2422 = vmatprep.subr.bf16.mxu0 %v2842_v20 }
  0x23   :  { %2337 = vmatmul.mubr.f32.gmra.mrb[2].mxu0 %v2849_v23 }
  0x24   :  { %2339 = vmatprep.mubr.f32.mxu0 %v2874_v34 }
  0x27   :  { %2340 = vmatmul.mubr.f32.gmra.mrb[4].mxu0 %v2905_v48 }
  0x28   :  { %2342 = vmatprep.mubr.f32.mxu0 %v2927_v62 }
  0x2b   :  { %2343 = vmatmul.mubr.f32.gmra.mrb[6].mxu0 %v2937_v6 }
  0x2c   :  { %2349 = vmatprep.mubr.f32.mxu0 %v2845_v21 }
  0x2f   :  { %2350 = vmatmul.mubr.f32.vlgmr.msra.gmra.mrb[0].mxu0 %v2858_v26 }
  0x30   :  { %2424 = vmatpush3.bf16.msra.mxu0 %v2842_v20  ;;  %2352 = vmatprep.mubr.f32.mxu0 %v2862_v28 }
  0x31   :  { %2426 = vmatprep.subr.bf16.mxu0 %v2425_v25 }
  0x33   :  { %2353 = vmatmul.mubr.f32.gmra.mrb[2].mxu0 %v2872_v33 }
  0x34   :  { %2355 = vmatprep.mubr.f32.mxu0 %v2894_v43 }
  0x37   :  { %2356 = vmatmul.mubr.f32.gmra.mrb[4].mxu0 %v2921_v58 }
  0x38   :  { %2358 = vmatprep.mubr.f32.mxu0 %v244_v5 }
  0x3b   :  { %2359 = vmatmul.mubr.f32.gmra.mrb[6].mxu0 %v254_v10 }
  0x3c   :  { %2365 = vmatprep.mubr.f32.mxu0 %v185_v31 }
  0x3f   :  { %2366 = vmatmul.mubr.f32.vlgmr.msra.gmra.mrb[0].mxu0 %v195_v36 }
  0x40   :  { %2428 = vmatpush3.bf16.msra.mxu0 %v2425_v25  ;;  %2368 = vmatprep.mubr.f32.mxu0 %v205_v38 }
  0x41   :  { %2430 = vmatprep.subr.bf16.mxu0 %v2842_v20 }
  0x43   :  { %2369 = vmatmul.mubr.f32.gmra.mrb[2].mxu0 %v215_v42 }
  0x44   :  { %2371 = vmatprep.mubr.f32.mxu0 %v225_v53 }
  0x47   :  { %2372 = vmatmul.mubr.f32.gmra.mrb[4].mxu0 %v235_v0 }
  0x48   :  { %2374 = vmatprep.mubr.f32.mxu0 %v245_v9 }
  0x4b   :  { %2375 = vmatmul.mubr.f32.gmra.mrb[6].mxu0 %v255_v14 }
  0x4c   :  { %2381 = vmatprep.mubr.f32.mxu0 %v2825_v11 }
  0x4f   :  { %2382 = vmatmul.mubr.f32.vlgmr.msra.gmra.mrb[0].mxu0 %v2832_v15 }
  0x50   :  { %2432 = vmatpush3.bf16.msra.mxu0 %v2842_v20  ;;  %2384 = vmatprep.mubr.f32.mxu0 %v2836_v17 }
  0x53   :  { %2385 = vmatmul.mubr.f32.gmra.mrb[2].mxu0 %v2849_v23 }
  0x54   :  { %2387 = vmatprep.mubr.f32.mxu0 %v2874_v34 }
  0x57   :  { %2388 = vmatmul.mubr.f32.gmra.mrb[4].mxu0 %v2905_v48 }
  0x58   :  { %2390 = vmatprep.mubr.f32.mxu0 %v2927_v62 }
  0x5b   :  { %2391 = vmatmul.mubr.f32.gmra.mrb[6].mxu0 %v2937_v6 }
  0x5c   :  { %2397 = vmatprep.mubr.f32.mxu0 %v2825_v11  ;;  %v2995_v11 = vld [vmem:[%s3698_s1] ss:$0 sm:$0xff] }
  0x5f   :  { %2398 = vmatmul.mubr.f32.vlgmr.msra.gmra.mrb[0].mxu0 %v2832_v15 }
  0x60   :  { %2400 = vmatprep.mubr.f32.mxu0 %v2836_v17 }
  0x63   :  { %2401 = vmatmul.mubr.f32.gmra.mrb[2].mxu0 %v2849_v23 }
  0x64   :  { %2403 = vmatprep.mubr.f32.mxu0 %v2874_v34 }
  0x67   :  { %2404 = vmatmul.mubr.f32.gmra.mrb[4].mxu0 %v2905_v48 }
  0x68   :  { %2406 = vmatprep.mubr.f32.mxu0 %v2927_v62 }
  0x6b   :  { %2407 = vmatmul.mubr.f32.gmra.mrb[6].mxu0 %v2937_v6 }
  0x84   :  { %v50_v16 = vpop.permute.xlu0 %49  ;;  %v60_v20 = vpop.permute.xlu1 %59 }
  0x88   :  { %v55_v21 = vpop.permute.xlu0 %54  ;;  %v65_v26 = vpop.permute.xlu1 %64 }
  0x8c   :  { %v70_v32 = vpop.permute.xlu0 %69  ;;  %v75_v36 = vpop.permute.xlu1 %74 }
  0x90   :  { %v80_v43 = vpop.permute.xlu0 %79 }
  0x91   :  { %v85_v46 = vpop.permute.xlu1 %84 }
 0x132   :  { %v2399_v22 = vpop.f32.mrb[0].mxu0 }
 0x133   :  { %v2997_v15 = vadd.f32 %v2399_v22, %v55_v21  ;;  %v830_v17 = vpop.f32.mrb[1].mxu0 }
 0x134   :  { %v2999_v23 = vadd.f32 %v830_v17, %v50_v16 }
 0x135   :  { %v884_v27 = vmul.f32 %v2997_v15, %v2995_v11 }
 0x136   :  { %v2402_v28 = vpop.f32.mrb[2].mxu0  ;;  %v883_v29 = vmul.f32 %v2999_v23, %v2995_v11 }
 0x137   :  { %v3005_v30 = vadd.f32 %v2402_v28, %v65_v26  ;;  %893 = vadd.xlane.f32.xlu1 %v884_v27  ;;  %v842_v31 = vpop.f32.mrb[3].mxu0 }
 0x138   :  { %891 = vadd.xlane.f32.xlu0 %v883_v29  ;;  %v3009_v34 = vadd.f32 %v842_v31, %v60_v20 }
 0x139   :  { %v886_v33 = vmul.f32 %v3005_v30, %v2995_v11 }
 0x13a   :  { %v2405_v35 = vpop.f32.mrb[4].mxu0  ;;  %v885_v42 = vmul.f32 %v3009_v34, %v2995_v11 }
 0x13b   :  { %v854_v37 = vpop.f32.mrb[5].mxu0  ;;  %v3013_v39 = vadd.f32 %v2405_v35, %v75_v36 }
 0x13c   :  { %v3011_v38 = vadd.f32 %v854_v37, %v70_v32  ;;  %897 = vadd.xlane.f32.xlu0 %v886_v33 }
 0x13d   :  { %v888_v49 = vmul.f32 %v3013_v39, %v2995_v11 }
 0x13e   :  { %v2408_v40 = vpop.f32.mrb[6].mxu0  ;;  %v887_v41 = vmul.f32 %v3011_v38, %v2995_v11 }
 0x13f   :  { %v866_v44 = vpop.f32.mrb[7].mxu0  ;;  %v3021_v47 = vadd.f32 %v2408_v40, %v85_v46 }
 0x140   :  { %v3019_v45 = vadd.f32 %v866_v44, %v80_v43  ;;  %899 = vadd.xlane.f32.xlu1 %v887_v41  ;;  %895 = vadd.xlane.f32.xlu0 %v885_v42 }
 0x141   :  { %v890_v50 = vmul.f32 %v3021_v47, %v2995_v11 }
 0x142   :  { %v889_v48 = vmul.f32 %v3019_v45, %v2995_v11 }
 0x144   :  { %903 = vadd.xlane.f32.xlu1 %v889_v48  ;;  %901 = vadd.xlane.f32.xlu0 %v888_v49  ;;  %v964_v49 = vld [vmem:[%s3699_s4 + $0x8] sm:$0xff] }
 0x148   :  { %905 = vadd.xlane.f32.xlu0 %v890_v50 }
 0x1c4   :  { %v894_v51 = vpop.xlane.xlu1 %893 }
 0x1c5   :  { %v3029_v52 = vmul.f32 0.009259259, %v894_v51  ;;  %v892_v53 = vpop.xlane.xlu0 %891 }
 0x1c6   :  { %v3031_v54 = vmul.f32 0.009259259, %v892_v53  ;;  %v963_v53 = vld [vmem:[%s3699_s4] sm:$0xff] }
 0x1c7   :  { %v916_v55 = vsub.f32 %v2997_v15, %v3029_v52 }
 0x1c8   :  { %v915_v56 = vsub.f32 %v2999_v23, %v3031_v54 }
 0x1c9   :  { %v898_v57 = vpop.xlane.xlu0 %897  ;;  %v924_v58 = vmul.f32 %v2995_v11, %v916_v55 }
 0x1ca   :  { %v3038_v59 = vmul.f32 0.009259259, %v898_v57  ;;  %v923_v60 = vmul.f32 %v2995_v11, %v915_v56 }
 0x1cb   :  { %v932_v61 = vmul.f32 %v924_v58, %v924_v58 }
 0x1cc   :  { %v918_v62 = vsub.f32 %v3005_v30, %v3038_v59  ;;  %v931_v63 = vmul.f32 %v923_v60, %v923_v60 }
 0x1cd   :  { %v900_v0 = vpop.xlane.xlu1 %899  ;;  %941 = vadd.xlane.f32.xlu0 %v932_v61  ;;  %v896_v1 = vpop.xlane.xlu0 %895 }
 0x1ce   :  { %v3043_v2 = vmul.f32 0.009259259, %v900_v0  ;;  %v3045_v3 = vmul.f32 0.009259259, %v896_v1  ;;  %939 = vadd.xlane.f32.xlu1 %v931_v63  ;;  %v926_v4 = vmul.f32 %v2995_v11, %v918_v62  ;;  %v996_v0 = vld [vmem:[%s3700_s5 + $0x8] sm:$0xff] }
 0x1d0   :  { %v919_v5 = vsub.f32 %v3011_v38, %v3043_v2  ;;  %v917_v6 = vsub.f32 %v3009_v34, %v3045_v3  ;;  %v934_v7 = vmul.f32 %v926_v4, %v926_v4 }
 0x1d1   :  { %v904_v8 = vpop.xlane.xlu1 %903  ;;  %v902_v9 = vpop.xlane.xlu0 %901 }
 0x1d2   :  { %v3052_v10 = vmul.f32 0.009259259, %v904_v8  ;;  %v3054_v12 = vmul.f32 0.009259259, %v902_v9  ;;  %945 = vadd.xlane.f32.xlu0 %v934_v7  ;;  %v925_v13 = vmul.f32 %v2995_v11, %v917_v6  ;;  %v927_v24 = vmul.f32 %v2995_v11, %v919_v5  ;;  %v965_v9 = vld [vmem:[%s3699_s4 + $0x10] sm:$0xff] }
 0x1d4   :  { %v921_v14 = vsub.f32 %v3019_v45, %v3052_v10  ;;  %v920_v18 = vsub.f32 %v3013_v39, %v3054_v12  ;;  %v933_v19 = vmul.f32 %v925_v13, %v925_v13  ;;  %v935_v22 = vmul.f32 %v927_v24, %v927_v24  ;;  %v966_v13 = vld [vmem:[%s3699_s4 + $0x18] sm:$0xff] }
 0x1d5   :  { %v906_v25 = vpop.xlane.xlu0 %905 }
 0x1d6   :  { %v3062_v16 = vmul.f32 0.009259259, %v906_v25  ;;  %943 = vadd.xlane.f32.xlu1 %v933_v19  ;;  %v928_v20 = vmul.f32 %v2995_v11, %v920_v18  ;;  %v929_v26 = vmul.f32 %v2995_v11, %v921_v14  ;;  %v997_v25 = vld [vmem:[%s3700_s5 + $0x10] sm:$0xff] }
 0x1d8   :  { %v922_v21 = vsub.f32 %v3021_v47, %v3062_v16  ;;  %v936_v17 = vmul.f32 %v928_v20, %v928_v20  ;;  %v937_v28 = vmul.f32 %v929_v26, %v929_v26  ;;  %v995_v20 = vld [vmem:[%s3700_s5] sm:$0xff] }
 0x1da   :  { %947 = vadd.xlane.f32.xlu1 %v935_v22  ;;  %949 = vadd.xlane.f32.xlu0 %v936_v17  ;;  %v930_v27 = vmul.f32 %v2995_v11, %v922_v21  ;;  %v967_v21 = vld [vmem:[%s3699_s4 + $0x20] sm:$0xff] }
 0x1dc   :  { %v938_v29 = vmul.f32 %v930_v27, %v930_v27 }
 0x1de   :  { %951 = vadd.xlane.f32.xlu1 %v937_v28  ;;  %953 = vadd.xlane.f32.xlu0 %v938_v29 }
 0x25a   :  { %v942_v31 = vpop.xlane.xlu0 %941 }
 0x25b   :  { %v956_v32 = vmul.f32 0.009259259, %v942_v31  ;;  %v940_v33 = vpop.xlane.xlu1 %939  ;;  %v998_v31 = vld [vmem:[%s3700_s5 + $0x18] sm:$0xff] }
 0x25c   :  { %v955_v35 = vmul.f32 0.009259259, %v940_v33 }
 0x25d   :  { %v972_v36 = vadd.f32 1e-05, %v956_v32  ;;  %v968_v32 = vld [vmem:[%s3699_s4 + $0x28] sm:$0xff] }
 0x25e   :  { %v971_v37 = vadd.f32 1e-05, %v955_v35 }
 0x25f   :  { %2740 = vrsqrt.f32 %v972_v36  ;;  %v946_v40 = vpop.xlane.xlu0 %945 }
 0x260   :  { %2742 = vrsqrt.f32 %v971_v37  ;;  %v958_v41 = vmul.f32 0.009259259, %v946_v40  ;;  %v969_v37 = vld [vmem:[%s3699_s4 + $0x30] sm:$0xff] }
 0x262   :  { %v974_v42 = vadd.f32 1e-05, %v958_v41 }
 0x263   :  { %v944_v43 = vpop.xlane.xlu1 %943 }
 0x264   :  { %v957_v44 = vmul.f32 0.009259259, %v944_v43  ;;  %2744 = vrsqrt.f32 %v974_v42 }
 0x266   :  { %v973_v46 = vadd.f32 1e-05, %v957_v44  ;;  %v970_v44 = vld [vmem:[%s3699_s4 + $0x38] sm:$0xff]  ;;  %s2760_s4 = smov 96  }
 0x267   :  { %v948_v11 = vpop.xlane.xlu1 %947  ;;  %v950_v48 = vpop.xlane.xlu0 %949 }
 0x268   :  { %2746 = vrsqrt.f32 %v973_v46  ;;  %v959_v50 = vmul.f32 0.009259259, %v948_v11  ;;  %v960_v51 = vmul.f32 0.009259259, %v950_v48  ;;  %v2757_v46 = vmov 0.0|0.0  }
 0x269   :  { %v2741_v55 = vpop.eup %2740  ;;  %2433 = vmatprep.subr.bf16.mxu0 %v2757_v46  ;;  %2505 = vmatprep.subr.bf16.mxu1 %v2757_v46 }
 0x26a   :  { %v2743_v56 = vpop.eup %2742  ;;  %v975_v57 = vadd.f32 1e-05, %v959_v50  ;;  %v976_v58 = vadd.f32 1e-05, %v960_v51  ;;  %v988_v60 = vmul.f32 %v2741_v55, %v964_v49  ;;  %v1001_v49 = vld [vmem:[%s3700_s5 + $0x30] sm:$0xff] }
 0x26b   :  { %v952_v61 = vpop.xlane.xlu1 %951  ;;  %v954_v62 = vpop.xlane.xlu0 %953  ;;  %v987_v63 = vmul.f32 %v2743_v56, %v963_v53  ;;  %v1002_v53 = vld [vmem:[%s3700_s5 + $0x38] sm:$0xff] }
 0x26c   :  { %2748 = vrsqrt.f32 %v975_v57  ;;  %v961_v1 = vmul.f32 0.009259259, %v952_v61  ;;  %1026 = vperm.xlu0 %2738, %v988_v60   ;;  %v1004_v4 = vmul.f32 %v988_v60, %v3029_v52  ;;  %v962_v6 = vmul.f32 0.009259259, %v954_v62 }
 0x26d   :  { %1021 = vperm.xlu1 %2739, %v987_v63   ;;  %2750 = vrsqrt.f32 %v976_v58  ;;  %v1003_v24 = vmul.f32 %v987_v63, %v3031_v54 }
 0x26e   :  { %v977_v5 = vadd.f32 1e-05, %v961_v1  ;;  %v1012_v7 = vsub.f32 %v996_v0, %v1004_v4  ;;  %v2745_v8 = vpop.eup %2744  ;;  %v978_v18 = vadd.f32 1e-05, %v962_v6 }
 0x26f   :  { %v990_v52 = vmul.f32 %v2745_v8, %v966_v13  ;;  %v1011_v54 = vsub.f32 %v995_v20, %v1003_v24 }
 0x270   :  { %2752 = vrsqrt.f32 %v977_v5 }
 0x271   :  { %1074 = vperm.xlu1 %2739, %v1012_v7   ;;  %2754 = vrsqrt.f32 %v978_v18  ;;  %v1006_v28 = vmul.f32 %v990_v52, %v3038_v59  ;;  %v999_v59 = vld [vmem:[%s3700_s5 + $0x20] sm:$0xff] }
 0x272   :  { %v2747_v14 = vpop.eup %2746 }
 0x273   :  { %v989_v19 = vmul.f32 %v2747_v14, %v965_v9  ;;  %v1014_v33 = vsub.f32 %v998_v31, %v1006_v28 }
 0x275   :  { %1031 = vperm.xlu0 %2738, %v989_v19   ;;  %1036 = vperm.xlu1 %2739, %v990_v52   ;;  %v1005_v22 = vmul.f32 %v989_v19, %v3045_v3 }
 0x276   :  { %v2749_v17 = vpop.eup %2748 }
 0x277   :  { %v1013_v26 = vsub.f32 %v997_v25, %v1005_v22  ;;  %v991_v27 = vmul.f32 %v2749_v17, %v967_v21  ;;  %v2751_v29 = vpop.eup %2750 }
 0x278   :  { %v992_v35 = vmul.f32 %v2751_v29, %v968_v32 }
 0x279   :  { %1079 = vperm.xlu0 %2738, %v1013_v26   ;;  %1069 = vperm.xlu1 %2739, %v1011_v54   ;;  %v1007_v3 = vmul.f32 %v991_v27, %v3043_v2  ;;  %v1000_v2 = vld [vmem:[%s3700_s5 + $0x28] sm:$0xff]  ;;  %s2759_s5 = smov 64  }
 0x27a   :  { %v2753_v36 = vpop.eup %2752  ;;  %v1008_v42 = vmul.f32 %v992_v35, %v3054_v12 }
 0x27b   :  { %v1015_v40 = vsub.f32 %v999_v59, %v1007_v3  ;;  %v993_v41 = vmul.f32 %v2753_v36, %v969_v37  ;;  %v2755_v43 = vpop.eup %2754 }
 0x27c   :  { %v1016_v11 = vsub.f32 %v1000_v2, %v1008_v42  ;;  %v994_v12 = vmul.f32 %v2755_v43, %v970_v44 }
 0x27d   :  { %1041 = vperm.xlu0 %2738, %v991_v27   ;;  %1084 = vperm.xlu1 %2739, %v1014_v33   ;;  %v1009_v48 = vmul.f32 %v993_v41, %v3052_v10 }
 0x27e   :  { %v1010_v51 = vmul.f32 %v994_v12, %v3062_v16 }
 0x27f   :  { %v1017_v50 = vsub.f32 %v1001_v49, %v1009_v48 }
 0x280   :  { %v1018_v55 = vsub.f32 %v1002_v53, %v1010_v51 }
 0x281   :  { %1089 = vperm.xlu0 %2738, %v1015_v40   ;;  %1046 = vperm.xlu1 %2739, %v992_v35  }
 0x285   :  { %1051 = vperm.xlu0 %2738, %v993_v41   ;;  %1094 = vperm.xlu1 %2739, %v1016_v11  }
 0x289   :  { %1099 = vperm.xlu0 %2738, %v1017_v50   ;;  %1056 = vperm.xlu1 %2739, %v994_v12  }
 0x28d   :  { %1104 = vperm.xlu1 %2739, %v1018_v55  }
 0x2eb   :  { %v1027_v56 = vpop.permute.xlu0 %1026 }
 0x2ec   :  { %v1022_v10 = vpop.permute.xlu1 %1021  ;;  %v1060_v57 = vmul.f32 %v2997_v15, %v1027_v56 }
 0x2ed   :  { %v1059_v0 = vmul.f32 %v2999_v23, %v1022_v10 }
 0x2f0   :  { %v1075_v58 = vpop.permute.xlu1 %1074 }
 0x2f1   :  { %v1108_v60 = vadd.f32 %v1075_v58, %v1060_v57 }
 0x2f3   :  { %v3128_v61 = vmax.f32 %v1108_v60, 0.0 }
 0x2f4   :  { %v1037_v62 = vpop.permute.xlu1 %1036  ;;  %v1032_v63 = vpop.permute.xlu0 %1031 }
 0x2f5   :  { %1133 = vrot.lane.b32.xlu1 %v3128_v61, %s2758_s21  ;;  %v1244_v16 = vand.u32 4294901760, %v3128_v61  ;;  %v1061_v1 = vmul.f32 %v3009_v34, %v1032_v63  ;;  %v1062_v8 = vmul.f32 %v3005_v30, %v1037_v62 }
 0x2f7   :  { %v1398_v7 = vsub.f32 %v3128_v61, %v1244_v16 }
 0x2f8   :  { %v1070_v4 = vpop.permute.xlu1 %1069  ;;  %v1080_v5 = vpop.permute.xlu0 %1079 }
 0x2f9   :  { %v1107_v6 = vadd.f32 %v1070_v4, %v1059_v0  ;;  %v1109_v15 = vadd.f32 %v1080_v5, %v1061_v1  ;;  %v1399_v24 = vand.u32 4294901760, %v1398_v7 }
 0x2fb   :  { %v3137_v9 = vmax.f32 %v1107_v6, 0.0  ;;  %v3139_v13 = vmax.f32 %v1109_v15, 0.0  ;;  %v1400_v29 = vsub.f32 %v1398_v7, %v1399_v24 }
 0x2fc   :  { %v1085_v14 = vpop.permute.xlu1 %1084  ;;  %v1042_v18 = vpop.permute.xlu0 %1041 }
 0x2fd   :  { %v1241_v19 = vand.u32 4294901760, %v3137_v9  ;;  %v1247_v23 = vand.u32 4294901760, %v3139_v13  ;;  %v1110_v52 = vadd.f32 %v1085_v14, %v1062_v8  ;;  %1131 = vrot.lane.b32.xlu0 %v3137_v9, %s2758_s21  ;;  %v1063_v34 = vmul.f32 %v3011_v38, %v1042_v18 }
 0x2fe   :  { %v1401_v43 = vand.u32 4294901760, %v1400_v29 }
 0x2ff   :  { %v3146_v25 = vmax.f32 %v1110_v52, 0.0  ;;  %v3148_v30 = vpack.c.bf16 %v1244_v16, %v1241_v19  ;;  %v1391_v20 = vsub.f32 %v3137_v9, %v1241_v19  ;;  %v1405_v21 = vsub.f32 %v3139_v13, %v1247_v23 }
 0x300   :  { %v1047_v22 = vpop.permute.xlu1 %1046  ;;  %v1090_v17 = vpop.permute.xlu0 %1089 }
 0x301   :  { %v1250_v26 = vand.u32 4294901760, %v3146_v25  ;;  %v1111_v54 = vadd.f32 %v1090_v17, %v1063_v34  ;;  %1137 = vrot.lane.b32.xlu1 %v3146_v25, %s2758_s21  ;;  %2435 = vmatpush1.bf16.msra.mxu0 %v3148_v30  ;;  %v1392_v38 = vand.u32 4294901760, %v1391_v20  ;;  %v1064_v27 = vmul.f32 %v3013_v39, %v1047_v22 }
 0x302   :  { %1135 = vrot.lane.b32.xlu0 %v3139_v13, %s2758_s21  ;;  %v2506_v28 = vpack.c.bf16 %v1398_v7, %v1391_v20  ;;  %2436 = vmatprep.subr.bf16.mxu0 %v2757_v46  ;;  %v1406_v31 = vand.u32 4294901760, %v1405_v21 }
 0x303   :  { %v3160_v32 = vmax.f32 %v1111_v54, 0.0  ;;  %v3162_v33 = vpack.c.bf16 %v1250_v26, %v1247_v23  ;;  %v1412_v3 = vsub.f32 %v3146_v25, %v1250_v26  ;;  %v1393_v35 = vsub.f32 %v1391_v20, %v1392_v38 }
 0x304   :  { %2507 = vmatpush1.bf16.msra.mxu1 %v2506_v28  ;;  %v1095_v36 = vpop.permute.xlu1 %1094  ;;  %v1052_v59 = vpop.permute.xlu0 %1051  ;;  %v3165_v37 = vpack.c.bf16 %v1399_v24, %v1392_v38  ;;  %v1407_v2 = vsub.f32 %v1405_v21, %v1406_v31 }
 0x305   :  { %v1253_v39 = vand.u32 4294901760, %v3160_v32  ;;  %v1112_v40 = vadd.f32 %v1095_v36, %v1064_v27  ;;  %2438 = vmatpush1.bf16.msra.mxu0 %v3162_v33  ;;  %2508 = vmatprep.subr.bf16.mxu1 %v2757_v46  ;;  %v2509_v41 = vpack.c.bf16 %v1412_v3, %v1405_v21  ;;  %v1394_v42 = vand.u32 4294901760, %v1393_v35 }
 0x306   :  { %1139 = vrot.lane.b32.xlu0 %v3160_v32, %s2758_s21  ;;  %2439 = vmatprep.subr.bf16.mxu0 %v2757_v46  ;;  %v1413_v44 = vand.u32 4294901760, %v1412_v3  ;;  %v1065_v48 = vmul.f32 %v3019_v45, %v1052_v59  ;;  %v1408_v57 = vand.u32 4294901760, %v1407_v2 }
 0x307   :  { %v1120_v11 = vmax.f32 %v1112_v40, 0.0  ;;  %v1419_v12 = vsub.f32 %v3160_v32, %v1253_v39  ;;  %v3175_v51 = vpack.c.bf16 %v1401_v43, %v1394_v42 }
 0x308   :  { %2510 = vmatpush1.bf16.msra.mxu1 %v2509_v41  ;;  %v1057_v49 = vpop.permute.xlu1 %1056  ;;  %v1100_v50 = vpop.permute.xlu0 %1099  ;;  %v1414_v53 = vsub.f32 %v1412_v3, %v1413_v44  ;;  %v3177_v55 = vpack.c.bf16 %v1413_v44, %v1406_v31 }
 0x309   :  { %v1256_v56 = vand.u32 4294901760, %v1120_v11  ;;  %v1113_v10 = vadd.f32 %v1100_v50, %v1065_v48  ;;  %1141 = vrot.lane.b32.xlu1 %v1120_v11, %s2758_s21  ;;  %2511 = vmatprep.subr.bf16.mxu1 %v2757_v46  ;;  %v1420_v60 = vand.u32 4294901760, %v1419_v12  ;;  %v1066_v45 = vmul.f32 %v3021_v47, %v1057_v49 }
 0x30a   :  { %v1415_v58 = vand.u32 4294901760, %v1414_v53 }
 0x30b   :  { %v1121_v62 = vmax.f32 %v1113_v10, 0.0  ;;  %v3182_v63 = vpack.c.bf16 %v1256_v56, %v1253_v39  ;;  %v1426_v16 = vsub.f32 %v1120_v11, %v1256_v56  ;;  %v1421_v15 = vsub.f32 %v1419_v12, %v1420_v60 }
 0x30c   :  { %v1105_v0 = vpop.permute.xlu1 %1104  ;;  %v3184_v1 = vpack.c.bf16 %v1415_v58, %v1408_v57 }
 0x30d   :  { %v1259_v4 = vand.u32 4294901760, %v1121_v62  ;;  %v1114_v5 = vadd.f32 %v1105_v0, %v1066_v45  ;;  %2441 = vmatpush1.bf16.msra.mxu0 %v3182_v63  ;;  %1143 = vrot.lane.b32.xlu0 %v1121_v62, %s2758_s21  ;;  %v2512_v6 = vpack.c.bf16 %v1426_v16, %v1419_v12  ;;  %v1427_v7 = vand.u32 4294901760, %v1426_v16 }
 0x30e   :  { %2442 = vmatprep.subr.bf16.mxu0 %v2757_v46  ;;  %v1422_v52 = vand.u32 4294901760, %v1421_v15 }
 0x30f   :  { %v1122_v8 = vmax.f32 %v1114_v5, 0.0  ;;  %2513 = vmatpush1.bf16.msra.mxu1 %v2512_v6  ;;  %v1433_v47 = vsub.f32 %v1121_v62, %v1259_v4  ;;  %v1428_v14 = vsub.f32 %v1426_v16, %v1427_v7  ;;  %v3190_v18 = vpack.c.bf16 %v1427_v7, %v1420_v60 }
 0x310   :  { %2514 = vmatprep.subr.bf16.mxu1 %v2757_v46 }
 0x311   :  { %v1262_v19 = vand.u32 4294901760, %v1122_v8  ;;  %1145 = vrot.lane.b32.xlu1 %v1122_v8, %s2758_s21  ;;  %1155 = vrot.lane.b32.xlu0 %v3137_v9, %s2759_s5  ;;  %v1434_v23 = vand.u32 4294901760, %v1433_v47  ;;  %v1429_v34 = vand.u32 4294901760, %v1428_v14 }
 0x313   :  { %v3195_v24 = vpack.c.bf16 %v1262_v19, %v1259_v4  ;;  %v1440_v20 = vsub.f32 %v1122_v8, %v1262_v19  ;;  %v3197_v21 = vpack.c.bf16 %v1429_v34, %v1422_v52  ;;  %v1435_v17 = vsub.f32 %v1433_v47, %v1434_v23 }
 0x315   :  { %1157 = vrot.lane.b32.xlu1 %v3128_v61, %s2759_s5  ;;  %1159 = vrot.lane.b32.xlu0 %v3139_v13, %s2759_s5  ;;  %v2515_v22 = vpack.c.bf16 %v1440_v20, %v1433_v47  ;;  %v1441_v26 = vand.u32 4294901760, %v1440_v20  ;;  %v1436_v61 = vand.u32 4294901760, %v1435_v17 }
 0x316   :  { %2444 = vmatpush1.bf16.msra.mxu0 %v3195_v24 }
 0x317   :  { %2516 = vmatpush1.bf16.msra.mxu1 %v2515_v22  ;;  %2445 = vmatprep.subr.bf16.mxu0 %v2757_v46  ;;  %v1442_v9 = vsub.f32 %v1440_v20, %v1441_v26  ;;  %v3205_v54 = vpack.c.bf16 %v1441_v26, %v1434_v23  ;;  %v2186_v22 = vld [vmem:[%s3701_s7] sm:$0xff] }
 0x318   :  { %2517 = vmatprep.subr.bf16.mxu1 %v2757_v46 }
 0x319   :  { %1161 = vrot.lane.b32.xlu1 %v3146_v25, %s2759_s5  ;;  %1163 = vrot.lane.b32.xlu0 %v3160_v32, %s2759_s5  ;;  %v1443_v13 = vand.u32 4294901760, %v1442_v9 }
 0x31b   :  { %v3212_v38 = vpack.c.bf16 %v1443_v13, %v1436_v61 }
 0x31d   :  { %1165 = vrot.lane.b32.xlu1 %v1120_v11, %s2759_s5  ;;  %1167 = vrot.lane.b32.xlu0 %v1121_v62, %s2759_s5 }
 0x321   :  { %1169 = vrot.lane.b32.xlu1 %v1122_v8, %s2759_s5 }
 0x367   :  { %v1134_v27 = vpop.permute.xlu1 %1133 }
 0x368   :  { %v1292_v28 = vand.u32 4294901760, %v1134_v27  ;;  %1189 = vrot.lane.b32.xlu1 %v1134_v27, %s2759_s5 }
 0x36a   :  { %v3218_v29 = vsub.f32 %v1134_v27, %v1292_v28 }
 0x36c   :  { %v1511_v31 = vand.u32 4294901760, %v3218_v29 }
 0x36e   :  { %v1512_v59 = vsub.f32 %v3218_v29, %v1511_v31 }
 0x36f   :  { %v1132_v25 = vpop.permute.xlu0 %1131 }
 0x370   :  { %v1289_v32 = vand.u32 4294901760, %v1132_v25  ;;  %1187 = vrot.lane.b32.xlu0 %v1132_v25, %s2759_s5  ;;  %v1513_v49 = vand.u32 4294901760, %v1512_v59 }
 0x372   :  { %v3222_v3 = vpack.c.bf16 %v1292_v28, %v1289_v32  ;;  %v3224_v35 = vsub.f32 %v1132_v25, %v1289_v32  ;;  %v1221_v25 = vld [vmem:[%s3702_s6 + $0x8] sm:$0xff] }
 0x373   :  { %v1138_v36 = vpop.permute.xlu1 %1137  ;;  %v2187_v32 = vld [vmem:[%s3701_s7 + $0x8] sm:$0xff]  ;;  %v1229_v59 = vsel %vm1211_vm2, %v1221_v25, 0 }
 0x374   :  { %v1504_v39 = vand.u32 4294901760, %v3224_v35  ;;  %v1298_v40 = vand.u32 4294901760, %v1138_v36  ;;  %v1136_v41 = vpop.permute.xlu0 %1135  ;;  %1193 = vrot.lane.b32.xlu1 %v1138_v36, %s2759_s5  ;;  %v2530_v42 = vpack.c.bf16 %v3218_v29, %v3224_v35 }
 0x375   :  { %v1295_v43 = vand.u32 4294901760, %v1136_v41  ;;  %1191 = vrot.lane.b32.xlu0 %v1136_v41, %s2759_s5 }
 0x376   :  { %v1505_v2 = vsub.f32 %v3224_v35, %v1504_v39  ;;  %v3233_v44 = vsub.f32 %v1138_v36, %v1298_v40  ;;  %v3235_v11 = vpack.c.bf16 %v1511_v31, %v1504_v39  ;;  %v2188_v36 = vld [vmem:[%s3701_s7 + $0x10] sm:$0xff] }
 0x377   :  { %v3237_v48 = vpack.c.bf16 %v1298_v40, %v1295_v43  ;;  %v3239_v12 = vsub.f32 %v1136_v41, %v1295_v43  ;;  %v3291_v41 = vand.u32 4294901760, %v1229_v59 }
 0x378   :  { %v1506_v50 = vand.u32 4294901760, %v1505_v2  ;;  %v1525_v53 = vand.u32 4294901760, %v3233_v44  ;;  %v1140_v56 = vpop.permute.xlu0 %1139 }
 0x379   :  { %v1518_v10 = vand.u32 4294901760, %v3239_v12  ;;  %v1301_v57 = vand.u32 4294901760, %v1140_v56  ;;  %1195 = vrot.lane.b32.xlu0 %v1140_v56, %s2759_s5  ;;  %v2533_v58 = vpack.c.bf16 %v3233_v44, %v3239_v12 }
 0x37a   :  { %v1526_v60 = vsub.f32 %v3233_v44, %v1525_v53  ;;  %v3247_v45 = vpack.c.bf16 %v1513_v49, %v1506_v50 }
 0x37b   :  { %v1519_v62 = vsub.f32 %v3239_v12, %v1518_v10  ;;  %v3250_v16 = vsub.f32 %v1140_v56, %v1301_v57  ;;  %v1142_v0 = vpop.permute.xlu1 %1141  ;;  %v3252_v4 = vpack.c.bf16 %v1525_v53, %v1518_v10  ;;  %v3300_v53 = vsub.f32 %v1229_v59, %v3291_v41  ;;  %v2189_v56 = vld [vmem:[%s3701_s7 + $0x18] sm:$0xff] }
 0x37c   :  { %v1527_v5 = vand.u32 4294901760, %v1526_v60  ;;  %v1304_v6 = vand.u32 4294901760, %v1142_v0  ;;  %1197 = vrot.lane.b32.xlu1 %v1142_v0, %s2759_s5 }
 0x37d   :  { %3710 = vst [vmem:[#allocation2_spill] sm:$0xff] %v3252_v4  ;;  %v1520_v15 = vand.u32 4294901760, %v1519_v62  ;;  %v1532_v7 = vand.u32 4294901760, %v3250_v16  ;;  %1716 = vmatprep.mubr.f32.mxu1 %v3300_v53 }
 0x37e   :  { %v3256_v8 = vpack.c.bf16 %v1304_v6, %v1301_v57  ;;  %v3258_v47 = vsub.f32 %v1142_v0, %v1304_v6  ;;  %v3704_v57 = vand.u32 4294901760, %v3300_v53 }
 0x37f   :  { %v1144_v14 = vpop.permute.xlu0 %1143  ;;  %v3260_v19 = vpack.c.bf16 %v1527_v5, %v1520_v15  ;;  %v1533_v20 = vsub.f32 %v3250_v16, %v1532_v7 }
 0x380   :  { %v1539_v23 = vand.u32 4294901760, %v3258_v47  ;;  %v1307_v52 = vand.u32 4294901760, %v1144_v14  ;;  %1199 = vrot.lane.b32.xlu0 %v1144_v14, %s2759_s5  ;;  %v1331_v5 = vsub.f32 %v3300_v53, %v3704_v57 }
 0x381   :  { %v1534_v31 = vand.u32 4294901760, %v1533_v20 }
 0x382   :  { %v1540_v17 = vsub.f32 %v3258_v47, %v1539_v23  ;;  %v3271_v26 = vsub.f32 %v1144_v14, %v1307_v52  ;;  %v3273_v9 = vpack.c.bf16 %v1539_v23, %v1532_v7  ;;  %v1332_v6 = vand.u32 4294901760, %v1331_v5 }
 0x383   :  { %v1146_v61 = vpop.permute.xlu1 %1145  ;;  %v1156_v14 = vpop.permute.xlu0 %1155 }
 0x384   :  { %3711 = vst [vmem:[#allocation3_spill] sm:$0xff] %v3273_v9  ;;  %v1541_v13 = vand.u32 4294901760, %v1540_v17  ;;  %v1546_v27 = vand.u32 4294901760, %v3271_v26  ;;  %v1310_v28 = vand.u32 4294901760, %v1146_v61  ;;  %1201 = vrot.lane.b32.xlu1 %v1146_v61, %s2759_s5  ;;  %2192 = vperm.xlu0 %2738, %v2186_v22  }
 0x385   :  { %1333 = vmatprep.mubr.f32.mxu0 %v1332_v6 }
 0x386   :  { %v3287_v39 = vpack.c.bf16 %v1310_v28, %v1307_v52  ;;  %v3289_v40 = vsub.f32 %v1146_v61, %v1310_v28  ;;  %v3293_v43 = vpack.c.bf16 %v1541_v13, %v1534_v31  ;;  %v1547_v2 = vsub.f32 %v3271_v26, %v1546_v27 }
 0x387   :  { %v1158_v7 = vpop.permute.xlu1 %1157  ;;  %v1160_v52 = vpop.permute.xlu0 %1159 }
 0x388   :  { %v1553_v49 = vand.u32 4294901760, %v3289_v40  ;;  %2197 = vperm.xlu1 %2739, %v2187_v32   ;;  %2202 = vperm.xlu0 %2738, %v2188_v36   ;;  %v1548_v62 = vand.u32 4294901760, %v1547_v2 }
 0x38a   :  { %v1554_v10 = vsub.f32 %v3289_v40, %v1553_v49  ;;  %v3308_v60 = vpack.c.bf16 %v1553_v49, %v1546_v27 }
 0x38b   :  { %v1162_v23 = vpop.permute.xlu1 %1161  ;;  %v1164_v22 = vpop.permute.xlu0 %1163 }
 0x38c   :  { %3712 = vst [vmem:[#allocation4_spill] sm:$0xff] %v3308_v60  ;;  %v1555_v0 = vand.u32 4294901760, %v1554_v10  ;;  %2207 = vperm.xlu1 %2739, %v2189_v56  }
 0x38e   :  { %v3313_v15 = vpack.c.bf16 %v1555_v0, %v1548_v62 }
 0x38f   :  { %v1166_v20 = vpop.permute.xlu1 %1165  ;;  %v1168_v13 = vpop.permute.xlu0 %1167 }
 0x393   :  { %v1170_v17 = vpop.permute.xlu1 %1169 }
 0x3da   :  { %v1190_v61 = vpop.permute.xlu1 %1189 }
 0x3db   :  { %v1213_v27 = vsel %vm1211_vm2, %v1158_v7, %v1190_v61 }
 0x3dc   :  { %v1268_v28 = vand.u32 4294901760, %v1213_v27 }
 0x3de   :  { %v3317_v36 = vsub.f32 %v1213_v27, %v1268_v28 }
 0x3e2   :  { %v1188_v25 = vpop.permute.xlu0 %1187 }
 0x3e3   :  { %v1212_v31 = vsel %vm1211_vm2, %v1156_v14, %v1188_v25 }
 0x3e4   :  { %v1265_v32 = vand.u32 4294901760, %v1212_v31 }
 0x3e6   :  { %v3319_v59 = vpack.c.bf16 %v1268_v28, %v1265_v32  ;;  %v3321_v2 = vsub.f32 %v1212_v31, %v1265_v32  ;;  %v1194_v49 = vpop.permute.xlu1 %1193 }
 0x3e7   :  { %v1215_v56 = vsel %vm1211_vm2, %v1162_v23, %v1194_v49  ;;  %v1192_v10 = vpop.permute.xlu0 %1191 }
 0x3e8   :  { %v1274_v62 = vand.u32 4294901760, %v1215_v56  ;;  %v1214_v0 = vsel %vm1211_vm2, %v1160_v52, %v1192_v10  ;;  %2447 = vmatpush1.bf16.msra.mxu0 %v3319_v59  ;;  %v2518_v5 = vpack.c.bf16 %v3317_v36, %v3321_v2 }
 0x3e9   :  { %v1271_v6 = vand.u32 4294901760, %v1214_v0  ;;  %2448 = vmatprep.subr.bf16.mxu0 %v2757_v46 }
 0x3ea   :  { %v3329_v7 = vsub.f32 %v1215_v56, %v1274_v62  ;;  %2519 = vmatpush1.bf16.msra.mxu1 %v2518_v5 }
 0x3eb   :  { %v3331_v14 = vpack.c.bf16 %v1274_v62, %v1271_v6  ;;  %v3333_v61 = vsub.f32 %v1214_v0, %v1271_v6  ;;  %v1196_v23 = vpop.permute.xlu0 %1195  ;;  %2520 = vmatprep.subr.bf16.mxu1 %v2757_v46 }
 0x3ec   :  { %v1216_v52 = vsel %vm1211_vm2, %v1164_v22, %v1196_v23 }
 0x3ed   :  { %2450 = vmatpush1.bf16.msra.mxu0 %v3331_v14  ;;  %v2521_v27 = vpack.c.bf16 %v3329_v7, %v3333_v61  ;;  %v1277_v28 = vand.u32 4294901760, %v1216_v52 }
 0x3ee   :  { %v1198_v25 = vpop.permute.xlu1 %1197  ;;  %2451 = vmatprep.subr.bf16.mxu0 %v2757_v46 }
 0x3ef   :  { %v1217_v31 = vsel %vm1211_vm2, %v1166_v20, %v1198_v25  ;;  %2522 = vmatpush1.bf16.msra.mxu1 %v2521_v27  ;;  %v3343_v49 = vsub.f32 %v1216_v52, %v1277_v28  ;;  %v1220_v52 = vld [vmem:[%s3702_s6] sm:$0xff] }
 0x3f0   :  { %v1280_v32 = vand.u32 4294901760, %v1217_v31  ;;  %2523 = vmatprep.subr.bf16.mxu1 %v2757_v46 }
 0x3f2   :  { %v3345_v56 = vpack.c.bf16 %v1280_v32, %v1277_v28  ;;  %v3347_v22 = vsub.f32 %v1217_v31, %v1280_v32  ;;  %v1200_v10 = vpop.permute.xlu0 %1199  ;;  %v3368_v31 = vand.u32 4294901760, %v1220_v52 }
 0x3f3   :  { %v1218_v62 = vsel %vm1211_vm2, %v1168_v13, %v1200_v10  ;;  %v1223_v13 = vld [vmem:[%s3702_s6 + $0x18] sm:$0xff]  ;;  %v1225_v10 = vld [vmem:[%s3702_s6 + $0x28] sm:$0xff] }
 0x3f4   :  { %2453 = vmatpush1.bf16.msra.mxu0 %v3345_v56  ;;  %v2524_v0 = vpack.c.bf16 %v3347_v22, %v3343_v49  ;;  %v1283_v20 = vand.u32 4294901760, %v1218_v62 }
 0x3f5   :  { %2454 = vmatprep.subr.bf16.mxu0 %v2757_v46 }
 0x3f6   :  { %v1202_v5 = vpop.permute.xlu1 %1201  ;;  %2525 = vmatpush1.bf16.msra.mxu1 %v2524_v0  ;;  %v3362_v27 = vsub.f32 %v1218_v62, %v1283_v20  ;;  %v1222_v0 = vld [vmem:[%s3702_s6 + $0x10] sm:$0xff] }
 0x3f7   :  { %v1219_v6 = vsel %vm1211_vm2, %v1170_v17, %v1202_v5  ;;  %2526 = vmatprep.subr.bf16.mxu1 %v2757_v46  ;;  %v1232_v17 = vsel %vm1211_vm2, %v1223_v13, 0  ;;  %v1235_v5 = vsel %vm1211_vm2, %v1225_v10, 0 }
 0x3f8   :  { %v1286_v23 = vand.u32 4294901760, %v1219_v6  ;;  %v3378_v62 = vand.u32 4294901760, %v1232_v17 }
 0x3fa   :  { %v3364_v28 = vpack.c.bf16 %v1286_v23, %v1283_v20  ;;  %v3366_v25 = vsub.f32 %v1219_v6, %v1286_v23  ;;  %v3385_v20 = vsub.f32 %v1220_v52, %v3368_v31  ;;  %v1227_v6 = vld [vmem:[%s3702_s6 + $0x38] sm:$0xff]  ;;  %v3393_v23 = vand.u32 4294901760, %v1222_v0 }
 0x3fb   :  { %v3399_v13 = vsub.f32 %v1232_v17, %v3378_v62  ;;  %v3401_v52 = vand.u32 4294901760, %v1235_v5  ;;  %v1238_v57 = vsel %vm1211_vm2, %v1227_v6, 0  ;;  %v1226_v6 = vld [vmem:[%s3702_s6 + $0x30] sm:$0xff] }
 0x3fc   :  { %2456 = vmatpush1.bf16.msra.mxu0 %v3364_v28  ;;  %v2527_v32 = vpack.c.bf16 %v3366_v25, %v3362_v27  ;;  %v3705_v10 = vand.u32 4294901760, %v3385_v20  ;;  %v3413_v35 = vsub.f32 %v1222_v0, %v3393_v23  ;;  %v3423_v50 = vand.u32 4294901760, %v1238_v57 }
 0x3fd   :  { %2457 = vmatprep.subr.bf16.mxu0 %v2757_v46  ;;  %v3706_v29 = vand.u32 4294901760, %v3399_v13  ;;  %v3421_v17 = vsub.f32 %v1235_v5, %v3401_v52  ;;  %v3442_v5 = vand.u32 4294901760, %v1226_v6 }
 0x3fe   :  { %2528 = vmatpush1.bf16.msra.mxu1 %v2527_v32  ;;  %v1224_v32 = vld [vmem:[%s3702_s6 + $0x20] sm:$0xff]  ;;  %v1337_v0 = vsub.f32 %v3385_v20, %v3705_v10  ;;  %v3713_v10 = vpack.c.bf16 %v3258_v47, %v3250_v16  ;;  %v3448_v34 = vsub.f32 %v1238_v57, %v3423_v50 }
 0x3ff   :  { %2529 = vmatprep.subr.bf16.mxu1 %v2757_v46  ;;  %v1346_v44 = vsub.f32 %v3399_v13, %v3706_v29  ;;  %v3714_v29 = vand.u32 4294901760, %v3413_v35  ;;  %v3715_v4 = vand.u32 4294901760, %v3421_v17  ;;  %v3462_v57 = vsub.f32 %v1226_v6, %v3442_v5 }
 0x400   :  { %2459 = vmatpush1.bf16.msra.mxu0 %v3222_v3  ;;  %v1338_v60 = vand.u32 4294901760, %v1337_v0  ;;  %v1375_v47 = vand.u32 4294901760, %v3448_v34 }
 0x401   :  { %2460 = vmatprep.subr.bf16.mxu0 %v2757_v46  ;;  %v1352_v12 = vsub.f32 %v3413_v35, %v3714_v29  ;;  %v1361_v16 = vsub.f32 %v3421_v17, %v3715_v4  ;;  %v1381_v4 = vand.u32 4294901760, %v3462_v57 }
 0x402   :  { %2531 = vmatpush1.bf16.msra.mxu1 %v2530_v42  ;;  %v3415_v42 = vand.u32 4294901760, %v1224_v32  ;;  %v1376_v6 = vsub.f32 %v3448_v34, %v1375_v47 }
 0x403   :  { %2532 = vmatprep.subr.bf16.mxu1 %v2757_v46  ;;  %v1353_v29 = vand.u32 4294901760, %v1352_v12 }
 0x404   :  { %2462 = vmatpush1.bf16.msra.mxu0 %v3237_v48  ;;  %v1377_v12 = vand.u32 4294901760, %v1376_v6 }
 0x405   :  { %2463 = vmatprep.subr.bf16.mxu0 %v2757_v46 }
 0x406   :  { %2534 = vmatpush1.bf16.msra.mxu1 %v2533_v58  ;;  %v3440_v58 = vsub.f32 %v1224_v32, %v3415_v42  ;;  %v1347_v32 = vand.u32 4294901760, %v1346_v44  ;;  %v1362_v44 = vand.u32 4294901760, %v1361_v16  ;;  %v3708_v16 = vand.u32 4294901760, %v3329_v7 }
 0x407   :  { %2535 = vmatprep.subr.bf16.mxu1 %v2757_v46 }
 0x408   :  { %2465 = vmatpush1.bf16.msra.mxu0 %v3256_v8  ;;  %v1366_v9 = vand.u32 4294901760, %v3440_v58 }
 0x409   :  { %2466 = vmatprep.subr.bf16.mxu0 %v2757_v46 }
 0x40a   :  { %2537 = vmatpush1.bf16.msra.mxu1 %v3713_v10  ;;  %v3716_v10 = vpack.c.bf16 %v3289_v40, %v3271_v26  ;;  %v1367_v0 = vsub.f32 %v3440_v58, %v1366_v9  ;;  %v1448_v26 = vand.u32 4294901760, %v3321_v2  ;;  %v3707_v40 = vand.u32 4294901760, %v3317_v36 }
 0x40b   :  { %2538 = vmatprep.subr.bf16.mxu1 %v2757_v46 }
 0x40c   :  { %2468 = vmatpush1.bf16.msra.mxu0 %v3287_v39 }
 0x40d   :  { %2469 = vmatprep.subr.bf16.mxu0 %v2757_v46 }
 0x40e   :  { %2540 = vmatpush1.bf16.msra.mxu1 %v3716_v10  ;;  %v1462_v10 = vand.u32 4294901760, %v3333_v61 }
 0x40f   :  { %1339 = vmatmul.mubr.f32.vlgmr.msra.gmra.mrb[8].mxu0 %v1338_v60  ;;  %2541 = vmatprep.subr.bf16.mxu1 %v2757_v46  ;;  %v1382_v60 = vsub.f32 %v3462_v57, %v1381_v4 }
 0x410   :  { %2471 = vmatpush1.bf16.msra.mxu0 %v3175_v51  ;;  %1348 = vmatprep.mubr.f32.mxu0 %v1347_v32  ;;  %v1368_v51 = vand.u32 4294901760, %v1367_v0  ;;  %v1449_v32 = vsub.f32 %v3321_v2, %v1448_v26  ;;  %v1463_v6 = vsub.f32 %v3333_v61, %v1462_v10  ;;  %v3725_v2 = vld [vmem:[#allocation2_spill] sm:$0xff]  ;;  %v3727_v61 = vld [vmem:[#allocation4_spill] sm:$0xff] }
 0x411   :  { %1719 = vmatmul.mubr.f32.vlgmr.msra.gmra.mrb[0].mxu1 %v3385_v20  ;;  %2472 = vmatprep.subr.bf16.mxu0 %v2757_v46 }
 0x412   :  { %2543 = vmatpush1.bf16.msra.mxu1 %v3148_v30  ;;  %1725 = vmatprep.mubr.f32.mxu1 %v3399_v13  ;;  %v1450_v0 = vand.u32 4294901760, %v1449_v32  ;;  %v1464_v32 = vand.u32 4294901760, %v1463_v6 }
 0x413   :  { %2544 = vmatprep.subr.bf16.mxu1 %v2757_v46  ;;  %1354 = vmatmul.mubr.f32.gmra.mrb[10].mxu0 %v1353_v29  ;;  %v1383_v29 = vand.u32 4294901760, %v1382_v60 }
 0x414   :  { %2474 = vmatpush1.bf16.msra.mxu0 %v3184_v1  ;;  %1363 = vmatprep.mubr.f32.mxu0 %v1362_v44  ;;  %v1456_v1 = vsub.f32 %v3317_v36, %v3707_v40  ;;  %v1470_v44 = vsub.f32 %v3329_v7, %v3708_v16  ;;  %v1483_v40 = vand.u32 4294901760, %v3347_v22  ;;  %v3709_v16 = vand.u32 4294901760, %v3366_v25 }
 0x415   :  { %2475 = vmatprep.subr.bf16.mxu0 %v2757_v46  ;;  %1728 = vmatmul.mubr.f32.gmra.mrb[2].mxu1 %v3413_v35 }
 0x416   :  { %2546 = vmatpush1.bf16.msra.mxu1 %v3162_v33  ;;  %1734 = vmatprep.mubr.f32.mxu1 %v3421_v17  ;;  %v1498_v6 = vsub.f32 %v3366_v25, %v3709_v16 }
 0x417   :  { %2547 = vmatprep.subr.bf16.mxu1 %v2757_v46  ;;  %1369 = vmatmul.mubr.f32.gmra.mrb[12].mxu0 %v1368_v51  ;;  %v1476_v51 = vand.u32 4294901760, %v3343_v49 }
 0x418   :  { %2477 = vmatpush1.bf16.msra.mxu0 %v3197_v21  ;;  %1378 = vmatprep.mubr.f32.mxu0 %v1377_v12  ;;  %v1457_v21 = vand.u32 4294901760, %v1456_v1  ;;  %v1471_v12 = vand.u32 4294901760, %v1470_v44  ;;  %v1484_v1 = vsub.f32 %v3347_v22, %v1483_v40 }
 0x419   :  { %2478 = vmatprep.subr.bf16.mxu0 %v2757_v46  ;;  %1737 = vmatmul.mubr.f32.gmra.mrb[4].mxu1 %v3440_v58 }
 0x41a   :  { %2549 = vmatpush1.bf16.msra.mxu1 %v3182_v63  ;;  %1743 = vmatprep.mubr.f32.mxu1 %v3448_v34  ;;  %v2482_v60 = vpack.c.bf16 %v1457_v21, %v1450_v0  ;;  %v1490_v0 = vand.u32 4294901760, %v3362_v27  ;;  %v1485_v44 = vand.u32 4294901760, %v1484_v1 }
 0x41b   :  { %2550 = vmatprep.subr.bf16.mxu1 %v2757_v46  ;;  %1384 = vmatmul.mubr.f32.gmra.mrb[14].mxu0 %v1383_v29  ;;  %v3717_v29 = vand.u32 4294901760, %v3300_v53  ;;  %v2485_v53 = vpack.c.bf16 %v1471_v12, %v1464_v32 }
 0x41c   :  { %2480 = vmatpush1.bf16.msra.mxu0 %v3212_v38  ;;  %1574 = vmatprep.mubr.f32.mxu0 %v3291_v41  ;;  %v1477_v38 = vsub.f32 %v3343_v49, %v1476_v51 }
 0x41d   :  { %2481 = vmatprep.subr.bf16.mxu0 %v2757_v46  ;;  %1746 = vmatmul.mubr.f32.gmra.mrb[6].mxu1 %v3462_v57 }
 0x41e   :  { %2552 = vmatpush1.bf16.msra.mxu1 %v3195_v24  ;;  %1842 = vmatprep.mubr.f32.mxu1 %v3717_v29  ;;  %v1478_v21 = vand.u32 4294901760, %v1477_v38  ;;  %v1491_v29 = vsub.f32 %v3362_v27, %v1490_v0 }
 0x41f   :  { %2553 = vmatprep.subr.bf16.mxu1 %v2757_v46 }
 0x420   :  { %2483 = vmatpush1.bf16.msra.mxu0 %v2482_v60  ;;  %v1499_v60 = vand.u32 4294901760, %v1498_v6  ;;  %v2488_v1 = vpack.c.bf16 %v1485_v44, %v1478_v21  ;;  %v1492_v16 = vand.u32 4294901760, %v1491_v29 }
 0x421   :  { %2484 = vmatprep.subr.bf16.mxu0 %v2757_v46 }
 0x422   :  { %2555 = vmatpush1.bf16.msra.mxu1 %v3319_v59  ;;  %v2491_v12 = vpack.c.bf16 %v1499_v60, %v1492_v16 }
 0x423   :  { %2556 = vmatprep.subr.bf16.mxu1 %v2757_v46 }
 0x424   :  { %2486 = vmatpush1.bf16.msra.mxu0 %v2485_v53 }
 0x425   :  { %2487 = vmatprep.subr.bf16.mxu0 %v2757_v46 }
 0x426   :  { %2558 = vmatpush1.bf16.msra.mxu1 %v3331_v14 }
 0x427   :  { %2559 = vmatprep.subr.bf16.mxu1 %v2757_v46 }
 0x428   :  { %2489 = vmatpush1.bf16.msra.mxu0 %v2488_v1 }
 0x429   :  { %2490 = vmatprep.subr.bf16.mxu0 %v2757_v46 }
 0x42a   :  { %2561 = vmatpush1.bf16.msra.mxu1 %v3345_v56 }
 0x42b   :  { %2562 = vmatprep.subr.bf16.mxu1 %v2757_v46 }
 0x42c   :  { %2492 = vmatpush1.bf16.msra.mxu0 %v2491_v12 }
 0x42d   :  { %2493 = vmatprep.subr.bf16.mxu0 %v2757_v46 }
 0x42e   :  { %2564 = vmatpush1.bf16.msra.mxu1 %v3364_v28 }
 0x42f   :  { %2565 = vmatprep.subr.bf16.mxu1 %v2757_v46 }
 0x430   :  { %2495 = vmatpush1.bf16.msra.mxu0 %v3247_v45  ;;  %v3718_v45 = vand.u32 4294901760, %v3385_v20 }
 0x431   :  { %2496 = vmatprep.subr.bf16.mxu0 %v2757_v46 }
 0x432   :  { %2567 = vmatpush1.bf16.msra.mxu1 %v3222_v3 }
 0x433   :  { %2568 = vmatprep.subr.bf16.mxu1 %v2757_v46 }
 0x434   :  { %2498 = vmatpush1.bf16.msra.mxu0 %v3260_v19  ;;  %v3719_v19 = vand.u32 4294901760, %v3399_v13 }
 0x435   :  { %2499 = vmatprep.subr.bf16.mxu0 %v2757_v46 }
 0x436   :  { %2570 = vmatpush1.bf16.msra.mxu1 %v3237_v48 }
 0x437   :  { %2571 = vmatprep.subr.bf16.mxu1 %v2757_v46 }
 0x438   :  { %2501 = vmatpush1.bf16.msra.mxu0 %v3293_v43  ;;  %v3720_v43 = vand.u32 4294901760, %v3413_v35 }
 0x439   :  { %2502 = vmatprep.subr.bf16.mxu0 %v2757_v46 }
 0x43a   :  { %2573 = vmatpush1.bf16.msra.mxu1 %v3256_v8 }
 0x43b   :  { %2574 = vmatprep.subr.bf16.mxu1 %v2757_v46 }
 0x43c   :  { %2504 = vmatpush1.bf16.msra.mxu0 %v3313_v15  ;;  %v3721_v15 = vand.u32 4294901760, %v3421_v17 }
 0x43e   :  { %2576 = vmatpush1.bf16.msra.mxu1 %v3287_v39 }
 0x43f   :  { %2577 = vmatprep.subr.bf16.mxu1 %v2757_v46  ;;  %1576 = vmatmul.mubr.f32.vlgmr.msra.gmra.mrb[8].mxu0 %v3368_v31 }
 0x440   :  { %1581 = vmatprep.mubr.f32.mxu0 %v3378_v62 }
 0x441   :  { %1846 = vmatmul.mubr.f32.vlgmr.msra.gmra.mrb[0].mxu1 %v3718_v45 }
 0x442   :  { %2579 = vmatpush1.bf16.msra.mxu1 %v3165_v37  ;;  %1853 = vmatprep.mubr.f32.mxu1 %v3719_v19  ;;  %v3722_v37 = vand.u32 4294901760, %v3317_v36 }
 0x443   :  { %2580 = vmatprep.subr.bf16.mxu1 %v2757_v46  ;;  %1583 = vmatmul.mubr.f32.gmra.mrb[10].mxu0 %v3393_v23 }
 0x444   :  { %1588 = vmatprep.mubr.f32.mxu0 %v3401_v52 }
 0x445   :  { %1857 = vmatmul.mubr.f32.gmra.mrb[2].mxu1 %v3720_v43 }
 0x446   :  { %2582 = vmatpush1.bf16.msra.mxu1 %v3177_v55  ;;  %1864 = vmatprep.mubr.f32.mxu1 %v3721_v15  ;;  %v2590_v55 = vpack.c.bf16 %v3722_v37, %v1448_v26 }
 0x447   :  { %2583 = vmatprep.subr.bf16.mxu1 %v2757_v46  ;;  %1590 = vmatmul.mubr.f32.gmra.mrb[12].mxu0 %v3415_v42 }
 0x448   :  { %1595 = vmatprep.mubr.f32.mxu0 %v3423_v50 }
 0x449   :  { %1868 = vmatmul.mubr.f32.gmra.mrb[4].mxu1 %v1366_v9  ;;  %v3724_v9 = vand.u32 4294901760, %v3366_v25 }
 0x44a   :  { %2585 = vmatpush1.bf16.msra.mxu1 %v3190_v18  ;;  %1875 = vmatprep.mubr.f32.mxu1 %v1375_v47  ;;  %v3723_v18 = vand.u32 4294901760, %v3329_v7  ;;  %v3726_v7 = vld [vmem:[#allocation3_spill] sm:$0xff] }
 0x44b   :  { %2586 = vmatprep.subr.bf16.mxu1 %v2757_v46  ;;  %1597 = vmatmul.mubr.f32.gmra.mrb[14].mxu0 %v3442_v5  ;;  %v2599_v36 = vpack.c.bf16 %v3724_v9, %v1490_v0 }
 0x44c   :  { %v2593_v34 = vpack.c.bf16 %v3723_v18, %v1462_v10 }
 0x44d   :  { %1879 = vmatmul.mubr.f32.gmra.mrb[6].mxu1 %v1381_v4 }
 0x44e   :  { %2588 = vmatpush1.bf16.msra.mxu1 %v3205_v54  ;;  %2021 = vmatprep.mubr.f32.mxu1 %v3291_v41  ;;  %v2596_v54 = vpack.c.bf16 %v1483_v40, %v1476_v51 }
 0x44f   :  { %2589 = vmatprep.subr.bf16.mxu1 %v2757_v46 }
 0x452   :  { %2591 = vmatpush1.bf16.msra.mxu1 %v2590_v55 }
 0x453   :  { %2592 = vmatprep.subr.bf16.mxu1 %v2757_v46 }
 0x456   :  { %2594 = vmatpush1.bf16.msra.mxu1 %v2593_v34 }
 0x457   :  { %2595 = vmatprep.subr.bf16.mxu1 %v2757_v46 }
 0x45a   :  { %2597 = vmatpush1.bf16.msra.mxu1 %v2596_v54 }
 0x45b   :  { %2598 = vmatprep.subr.bf16.mxu1 %v2757_v46 }
 0x45e   :  { %2600 = vmatpush1.bf16.msra.mxu1 %v2599_v36 }
 0x45f   :  { %2601 = vmatprep.subr.bf16.mxu1 %v2757_v46 }
 0x462   :  { %2603 = vmatpush1.bf16.msra.mxu1 %v3235_v11 }
 0x463   :  { %2604 = vmatprep.subr.bf16.mxu1 %v2757_v46 }
 0x466   :  { %2606 = vmatpush1.bf16.msra.mxu1 %v3725_v2 }
 0x467   :  { %2607 = vmatprep.subr.bf16.mxu1 %v2757_v46 }
 0x46a   :  { %2609 = vmatpush1.bf16.msra.mxu1 %v3726_v7 }
 0x46b   :  { %2610 = vmatprep.subr.bf16.mxu1 %v2757_v46 }
 0x46e   :  { %2612 = vmatpush1.bf16.msra.mxu1 %v3727_v61 }
 0x46f   :  { %2613 = vmatprep.subr.bf16.mxu1 %v2757_v46 }
 0x471   :  { %2023 = vmatmul.mubr.f32.vlgmr.msra.gmra.mrb[0].mxu1 %v3368_v31 }
 0x472   :  { %2615 = vmatpush1.bf16.msra.mxu1 %v3148_v30  ;;  %2028 = vmatprep.mubr.f32.mxu1 %v3378_v62 }
 0x473   :  { %2616 = vmatprep.subr.bf16.mxu1 %v2757_v46 }
 0x475   :  { %2030 = vmatmul.mubr.f32.gmra.mrb[2].mxu1 %v3393_v23 }
 0x476   :  { %2618 = vmatpush1.bf16.msra.mxu1 %v3162_v33  ;;  %2035 = vmatprep.mubr.f32.mxu1 %v3401_v52 }
 0x477   :  { %2619 = vmatprep.subr.bf16.mxu1 %v2757_v46 }
 0x479   :  { %2037 = vmatmul.mubr.f32.gmra.mrb[4].mxu1 %v3415_v42 }
 0x47a   :  { %2621 = vmatpush1.bf16.msra.mxu1 %v3182_v63  ;;  %2042 = vmatprep.mubr.f32.mxu1 %v3423_v50 }
 0x47b   :  { %2622 = vmatprep.subr.bf16.mxu1 %v2757_v46 }
 0x47d   :  { %2044 = vmatmul.mubr.f32.gmra.mrb[6].mxu1 %v3442_v5 }
 0x47e   :  { %2624 = vmatpush1.bf16.msra.mxu1 %v3195_v24  ;;  %2138 = vmatprep.mubr.f32.mxu1 %v3291_v41 }
 0x47f   :  { %2625 = vmatprep.subr.bf16.mxu1 %v2757_v46 }
 0x482   :  { %2627 = vmatpush1.bf16.msra.mxu1 %v3319_v59 }
 0x483   :  { %2628 = vmatprep.subr.bf16.mxu1 %v2757_v46 }
 0x486   :  { %2630 = vmatpush1.bf16.msra.mxu1 %v3331_v14 }
 0x487   :  { %2631 = vmatprep.subr.bf16.mxu1 %v2757_v46 }
 0x48a   :  { %2633 = vmatpush1.bf16.msra.mxu1 %v3345_v56 }
 0x48b   :  { %2634 = vmatprep.subr.bf16.mxu1 %v2757_v46 }
 0x48e   :  { %2636 = vmatpush1.bf16.msra.mxu1 %v3364_v28 }
 0x48f   :  { %2637 = vmatprep.subr.bf16.mxu1 %v2757_v46 }
 0x492   :  { %2639 = vmatpush1.bf16.msra.mxu1 %v3222_v3 }
 0x493   :  { %2640 = vmatprep.subr.bf16.mxu1 %v2757_v46 }
 0x496   :  { %2642 = vmatpush1.bf16.msra.mxu1 %v3237_v48 }
 0x497   :  { %2643 = vmatprep.subr.bf16.mxu1 %v2757_v46 }
 0x49a   :  { %2645 = vmatpush1.bf16.msra.mxu1 %v3256_v8 }
 0x49b   :  { %2646 = vmatprep.subr.bf16.mxu1 %v2757_v46 }
 0x49e   :  { %2648 = vmatpush1.bf16.msra.mxu1 %v3287_v39 }
 0x4a1   :  { %2140 = vmatmul.mubr.f32.vlgmr.msra.gmra.mrb[0].mxu1 %v3368_v31  ;;  %v2193_v31 = vpop.permute.xlu0 %2192 }
 0x4a2   :  { %2145 = vmatprep.mubr.f32.mxu1 %v3378_v62  ;;  %v2198_v62 = vpop.permute.xlu1 %2197 }
 0x4a5   :  { %2147 = vmatmul.mubr.f32.gmra.mrb[2].mxu1 %v3393_v23  ;;  %v2203_v20 = vpop.permute.xlu0 %2202 }
 0x4a6   :  { %2152 = vmatprep.mubr.f32.mxu1 %v3401_v52  ;;  %v2208_v23 = vpop.permute.xlu1 %2207 }
 0x4a9   :  { %2154 = vmatmul.mubr.f32.gmra.mrb[4].mxu1 %v3415_v42 }
 0x4aa   :  { %2159 = vmatprep.mubr.f32.mxu1 %v3423_v50 }
 0x4ad   :  { %2161 = vmatmul.mubr.f32.gmra.mrb[6].mxu1 %v3442_v5 }
 0x512   :  { %v1577_v30 = vpop.f32.mrb[8].mxu0 }
 0x513   :  { %v1579_v33 = vpop.f32.mrb[9].mxu0 }
 0x516   :  { %v1584_v63 = vpop.f32.mrb[10].mxu0 }
 0x517   :  { %v1586_v46 = vpop.f32.mrb[11].mxu0 }
 0x51a   :  { %v1591_v24 = vpop.f32.mrb[12].mxu0 }
 0x51b   :  { %v1593_v3 = vpop.f32.mrb[13].mxu0 }
 0x51e   :  { %v1598_v11 = vpop.f32.mrb[14].mxu0 }
 0x51f   :  { %v1600_v48 = vpop.f32.mrb[15].mxu0 }
 0x574   :  { %v2141_v8 = vpop.f32.mrb[0].mxu1 }
 0x575   :  { %v2657_v39 = vadd.f32 %v2141_v8, %v1577_v30  ;;  %v2143_v41 = vpop.f32.mrb[1].mxu1 }
 0x577   :  { %2170 = vrot.lane.b32.xlu0 %v2657_v39, %s2759_s5 }
 0x578   :  { %v2148_v59 = vpop.f32.mrb[2].mxu1 }
 0x579   :  { %v2658_v14 = vadd.f32 %v2148_v59, %v1584_v63  ;;  %v2150_v49 = vpop.f32.mrb[3].mxu1 }
 0x57b   :  { %2172 = vrot.lane.b32.xlu1 %v2658_v14, %s2759_s5 }
 0x57c   :  { %v2155_v50 = vpop.f32.mrb[4].mxu1 }
 0x57d   :  { %v2659_v56 = vadd.f32 %v2155_v50, %v1591_v24  ;;  %v2157_v22 = vpop.f32.mrb[5].mxu1 }
 0x57f   :  { %2174 = vrot.lane.b32.xlu0 %v2659_v56, %s2759_s5 }
 0x580   :  { %v2162_v27 = vpop.f32.mrb[6].mxu1 }
 0x581   :  { %v2660_v28 = vadd.f32 %v2162_v27, %v1598_v11  ;;  %v2164_v25 = vpop.f32.mrb[7].mxu1 }
 0x583   :  { %2176 = vrot.lane.b32.xlu1 %v2660_v28, %s2759_s5 }
 0x5e9   :  { %v2171_v13 = vpop.permute.xlu0 %2170 }
 0x5ea   :  { %v2182_v52 = vmax.f32 %v2657_v39, %v2171_v13 }
 0x5ec   :  { %v2210_v35 = vadd.f32 %v2193_v31, %v2182_v52 }
 0x5ed   :  { %v2173_v42 = vpop.permute.xlu1 %2172 }
 0x5ee   :  { %v2214_v17 = vmax.f32 %v2210_v35, 0.0  ;;  %v2183_v58 = vmax.f32 %v2658_v14, %v2173_v42 }
 0x5f0   :  { %2219 = vst.msk [vmem:[%s3703_s8] sm:$0xff] %vm2218_vm3, %v2214_v17  ;;  %v2211_v5 = vadd.f32 %v2198_v62, %v2183_v58  ;;  %2227 = vrot.lane.b32.xlu0 %v2214_v17, %s2760_s4 }
 0x5f1   :  { %v2175_v47 = vpop.permute.xlu0 %2174 }
 0x5f2   :  { %v2215_v57 = vmax.f32 %v2211_v5, 0.0  ;;  %v2184_v4 = vmax.f32 %v2659_v56, %v2175_v47 }
 0x5f4   :  { %2220 = vst.msk [vmem:[%s3703_s8 + $0x8] sm:$0xff] %vm2218_vm3, %v2215_v57  ;;  %v2212_v26 = vadd.f32 %v2203_v20, %v2184_v4  ;;  %2229 = vrot.lane.b32.xlu1 %v2215_v57, %s2760_s4 }
 0x5f5   :  { %v2177_v40 = vpop.permute.xlu1 %2176 }
 0x5f6   :  { %v2216_v16 = vmax.f32 %v2212_v26, 0.0  ;;  %v2185_v10 = vmax.f32 %v2660_v28, %v2177_v40 }
 0x5f8   :  { %2221 = vst.msk [vmem:[%s3703_s8 + $0x10] sm:$0xff] %vm2218_vm3, %v2216_v16  ;;  %v2213_v51 = vadd.f32 %v2208_v23, %v2185_v10  ;;  %2231 = vrot.lane.b32.xlu0 %v2216_v16, %s2760_s4 }
 0x5fa   :  { %v2217_v32 = vmax.f32 %v2213_v51, 0.0 }
 0x5fc   :  { %2222 = vst.msk [vmem:[%s3703_s8 + $0x18] sm:$0xff] %vm2218_vm3, %v2217_v32  ;;  %2233 = vrot.lane.b32.xlu1 %v2217_v32, %s2760_s4 }
 0x662   :  { %v2228_v38 = vpop.permute.xlu0 %2227 }
 0x663   :  { %2249 = vst.msk [vmem:[%s3703_s8 + $0x20] sm:$0xff] %vm2218_vm3, %v2228_v38 }
 0x666   :  { %v2230_v0 = vpop.permute.xlu1 %2229 }
 0x667   :  { %2250 = vst.msk [vmem:[%s3703_s8 + $0x28] sm:$0xff] %vm2218_vm3, %v2230_v0 }
 0x66a   :  { %v2232_v44 = vpop.permute.xlu0 %2231 }
 0x66b   :  { %2251 = vst.msk [vmem:[%s3703_s8 + $0x30] sm:$0xff] %vm2218_vm3, %v2232_v44 }
 0x66e   :  { %v2234_v6 = vpop.permute.xlu1 %2233 }
 0x66f   :  { %2252 = vst.msk [vmem:[%s3703_s8 + $0x38] sm:$0xff] %vm2218_vm3, %v2234_v6 }

</bundles_post_ra>
